<compile_context>
chip_gen: v7x
topology: tpu7x:2x2x1
jax: 0.10.0
libtpu: 0.0.40
codegen_flags: <defaults>
</compile_context>

<pallas_src>
import functools

import jax
import jax.numpy as jnp
from jax.experimental import pallas as pl
from jax.experimental.pallas import tpu as pltpu

# ----------------------------- config (small) ------------------------------
PHONE_VOCAB = 32
TARGET_VOCAB = 64
VOCAB = PHONE_VOCAB + TARGET_VOCAB + 10          # phone + target + 10
VOCAB_PAD = 128                                  # lane-dense LM head width
HIDDEN = 32
INTERMEDIATE = 64
N_LAYERS = 2
N_HEADS = 4
HEAD_DIM = HIDDEN // N_HEADS
PAD_ID = PHONE_VOCAB + TARGET_VOCAB + 1          # analogous to 1281
BOS_TARGET = PAD_ID + 1
EOS_TARGET = PAD_ID + 2
BOS_PHONE = PAD_ID + 3
EOS_PHONE = PAD_ID + 4
RMS_EPS = 1e-6
ROPE_THETA = 10000.0
NEG_INF = -1e9


# --------------------------- fused model kernel ----------------------------
def _fused_lm_kernel(x_ref, mask_ref, cos_ref, sin_ref, rot_ref,
                     in_norm_ref, post_norm_ref, wqkv_ref, wo_ref,
                     wgu_ref, wdown_ref, fnorm_ref, head_ref,
                     logits_ref, *, n_layers, n_heads, head_dim, inter,
                     eps, scale):
    """One grid step = full forward of one batch element, fully VMEM-resident."""
    L, D = x_ref.shape
    f32 = jnp.float32
    bf16 = jnp.bfloat16

    x = x_ref[...]                                    # (L, D) residual stream, f32
    cos = cos_ref[...]                                # (L, D) per-head cos, tiled
    sin = sin_ref[...]                                # (L, D)
    rot = rot_ref[...]                                # (D, D) bf16 block-diag rotate-half

    # Causal + key-padding additive bias, built in-kernel (no SxS HBM mask).
    row = jax.lax.broadcasted_iota(jnp.int32, (L, L), 0)
    col = jax.lax.broadcasted_iota(jnp.int32, (L, L), 1)
    key_ok = mask_ref[...] > 0                        # (1, L) bool
    allowed = (col <= row) & key_ok                   # (L, L)
    bias = jnp.where(allowed, 0.0, NEG_INF).astype(f32)

    def rmsnorm(h, w):                                # h (L, D), w (1, D) f32
        var = jnp.mean(h * h, axis=-1, keepdims=True)
        return h * jax.lax.rsqrt(var + eps) * w

    def mm(a, b):                                     # bf16 MXU, f32 accumulate
        return jnp.dot(a.astype(bf16), b.astype(bf16),
                       preferred_element_type=f32)

    for layer in range(n_layers):                     # static unroll (2 layers)
        # ------------------------- attention block -------------------------
        h = rmsnorm(x, in_norm_ref[layer])
        qkv = mm(h, wqkv_ref[layer])                  # (L, 3D) fused QKV matmul
        q = qkv[:, :D]
        k = qkv[:, D:2 * D]
        v = qkv[:, 2 * D:]

        # RoPE for all heads at once: x*cos + rotate_half(x)*sin, where
        # rotate_half is a constant block-diagonal +/-1 permutation matmul.
        q = q * cos + mm(q, rot) * sin
        k = k * cos + mm(k, rot) * sin

        wo = wo_ref[layer]                            # (D, D) bf16
        attn_out = jnp.zeros((L, D), f32)
        for hh in range(n_heads):                     # static unroll (4 heads)
            lo = hh * head_dim
            hi = lo + head_dim
            qh = q[:, lo:hi]                          # (L, Dh)
            kh = k[:, lo:hi]
            vh = v[:, lo:hi]
            s = jax.lax.dot_general(qh.astype(bf16), kh.astype(bf16),
                                    (((1,), (1,)), ((), ())),
                                    preferred_element_type=f32) * scale
            s = s + bias
            s = s - jnp.max(s, axis=-1, keepdims=True)
            p = jnp.exp(s)
            p = p * pl.reciprocal(jnp.sum(p, axis=-1, keepdims=True),
                                  approx=True)
            oh = mm(p, vh)                            # (L, Dh)
            # fold output projection per head: attn @ Wo == sum_h oh @ Wo[rows_h]
            attn_out = attn_out + mm(oh, wo[lo:hi, :])
        x = x + attn_out

        # -------------------------- SwiGLU MLP -----------------------------
        h = rmsnorm(x, post_norm_ref[layer])
        gu = mm(h, wgu_ref[layer])                    # (L, 2*inter) fused gate|up
        gate = gu[:, :inter]
        up = gu[:, inter:]
        act = gate * jax.nn.sigmoid(gate) * up        # SiLU(gate) * up
        x = x + mm(act, wdown_ref[layer])

    h = rmsnorm(x, fnorm_ref[...])
    logits_ref[...] = mm(h, head_ref[...])            # (L, VOCAB_PAD), lane-dense


# ------------------------------ model glue ---------------------------------
def build_rope_tables(L, head_dim, n_heads):
    inv_freq = 1.0 / (ROPE_THETA ** (jnp.arange(0, head_dim, 2,
                                                dtype=jnp.float32) / head_dim))
    pos = jnp.arange(L, dtype=jnp.float32)
    freqs = pos[:, None] * inv_freq[None, :]
    emb = jnp.concatenate([freqs, freqs], axis=-1)    # (L, head_dim)
    cos = jnp.tile(jnp.cos(emb), (1, n_heads))        # (L, head_dim * n_heads)
    sin = jnp.tile(jnp.sin(emb), (1, n_heads))
    return cos, sin


def build_rotate_half_matrix(hidden, head_dim):
    # Per-head rotate_half as a matmul: (y @ Rh) = [-y[d:], y[:d]]
    d2 = head_dim // 2
    idx = jnp.arange(d2)
    rh = jnp.zeros((head_dim, head_dim), jnp.float32)
    rh = rh.at[idx, idx + d2].set(1.0)
    rh = rh.at[idx + d2, idx].set(-1.0)
    n_heads = hidden // head_dim
    return jnp.kron(jnp.eye(n_heads, dtype=jnp.float32), rh)   # block diagonal


def llama_causal_lm(params, input_ids, attention_mask):
    B, L = input_ids.shape
    # Embedding gather stays at the XLA level (tiny; no clean tile pattern).
    x = params["embed"][input_ids].astype(jnp.float32)          # (B, L, D)
    cos, sin = build_rope_tables(L, HEAD_DIM, N_HEADS)
    rot = build_rotate_half_matrix(HIDDEN, HEAD_DIM).astype(jnp.bfloat16)
    mask3 = attention_mask.reshape(B, 1, L).astype(jnp.int32)

    kernel = functools.partial(
        _fused_lm_kernel, n_layers=N_LAYERS, n_heads=N_HEADS,
        head_dim=HEAD_DIM, inter=INTERMEDIATE, eps=RMS_EPS,
        scale=1.0 / float(HEAD_DIM) ** 0.5)

    def full_spec(shape):
        n = len(shape)
        return pl.BlockSpec(shape, lambda b, _n=n: (0,) * _n)

    def per_batch_spec(shape):
        n = len(shape)
        return pl.BlockSpec((pl.Squeezed(),) + shape,
                            lambda b, _n=n: (b,) + (0,) * _n)

    logits_pad = pl.pallas_call(
        kernel,
        out_shape=jax.ShapeDtypeStruct((B, L, VOCAB_PAD), jnp.float32),
        grid=(B,),
        in_specs=[
            per_batch_spec((L, HIDDEN)),                     # x
            per_batch_spec((1, L)),                          # key mask
            full_spec((L, HIDDEN)),                          # cos
            full_spec((L, HIDDEN)),                          # sin
            full_spec((HIDDEN, HIDDEN)),                     # rotate-half matrix (bf16)
            full_spec((N_LAYERS, 1, HIDDEN)),                # in_norm (stacked)
            full_spec((N_LAYERS, 1, HIDDEN)),                # post_norm (stacked)
            full_spec((N_LAYERS, HIDDEN, 3 * HIDDEN)),       # fused wqkv (bf16)
            full_spec((N_LAYERS, HIDDEN, HIDDEN)),           # wo (bf16)
            full_spec((N_LAYERS, HIDDEN, 2 * INTERMEDIATE)), # fused gate|up (bf16)
            full_spec((N_LAYERS, INTERMEDIATE, HIDDEN)),     # w_down (bf16)
            full_spec((1, HIDDEN)),                          # final_norm
            full_spec((HIDDEN, VOCAB_PAD)),                  # lm_head (bf16, lane-padded)
        ],
        out_specs=per_batch_spec((L, VOCAB_PAD)),
        compiler_params=pltpu.CompilerParams(
            dimension_semantics=("parallel",)),
    )(x, mask3, cos, sin, rot, params["in_norm"], params["post_norm"],
      params["wqkv"], params["wo"], params["wgu"], params["wdown"],
      params["final_norm"], params["lm_head_pad"])

    # Padded columns are never seen by loss / top-k: slice back to VOCAB.
    return logits_pad[..., :VOCAB]


def causal_lm_loss(logits, labels):
    shift_logits = logits[:, :-1, :]
    shift_labels = labels[:, 1:]
    valid = (shift_labels != -100)
    safe = jnp.where(valid, shift_labels, 0)
    logp = jax.nn.log_softmax(shift_logits, axis=-1)
    ll = jnp.take_along_axis(logp, safe[..., None], axis=-1)[..., 0]
    num = -jnp.sum(ll * valid.astype(jnp.float32))
    den = jnp.maximum(jnp.sum(valid.astype(jnp.float32)), 1.0)
    return num / den


# ------------------- ValleAR label preparation (exact port) ----------------
def add_phone_eos_bos_label(phone_ids, phone_mask):
    phone_ids = phone_ids + TARGET_VOCAB * phone_mask
    phone_ids = phone_ids * phone_mask
    phone_ids = (jnp.pad(phone_ids, ((0, 0), (0, 1)), constant_values=0)
                 + EOS_PHONE * jnp.pad(1 - phone_mask, ((0, 0), (0, 1)),
                                       constant_values=1))
    phone_mask = jnp.pad(phone_mask, ((0, 0), (1, 0)), constant_values=1)
    phone_ids = phone_ids * phone_mask + PAD_ID * (1 - phone_mask)
    phone_ids = jnp.pad(phone_ids, ((0, 0), (1, 0)), constant_values=BOS_PHONE)
    phone_mask = jnp.pad(phone_mask, ((0, 0), (1, 0)), constant_values=1)
    phone_label = -100 * jnp.ones_like(phone_ids)
    return phone_ids, phone_mask, phone_label


def add_target_eos_bos_label(target_ids, target_mask):
    target_ids = target_ids * target_mask
    target_ids = (jnp.pad(target_ids, ((0, 0), (0, 1)), constant_values=0)
                  + EOS_TARGET * jnp.pad(1 - target_mask, ((0, 0), (0, 1)),
                                         constant_values=1))
    target_mask = jnp.pad(target_mask, ((0, 0), (1, 0)), constant_values=1)
    target_ids = target_ids * target_mask + PAD_ID * (1 - target_mask)
    target_ids = jnp.pad(target_ids, ((0, 0), (1, 0)), constant_values=BOS_TARGET)
    target_mask = jnp.pad(target_mask, ((0, 0), (1, 0)), constant_values=1)
    target_label = target_ids * target_mask + (-100) * (1 - target_mask)
    return target_ids, target_mask, target_label


def valle_ar_forward(params, phone_ids, phone_mask, target_ids, target_mask):
    phone_ids, phone_mask, phone_label = add_phone_eos_bos_label(phone_ids, phone_mask)
    target_ids, target_mask, target_label = add_target_eos_bos_label(target_ids, target_mask)

    input_token_ids = jnp.concatenate([phone_ids, target_ids], axis=-1)
    attention_mask = jnp.concatenate([phone_mask, target_mask], axis=-1)
    labels = jnp.concatenate([phone_label, target_label], axis=-1)

    logits = llama_causal_lm(params, input_token_ids, attention_mask)
    loss = causal_lm_loss(logits, labels)

    tgt_len = target_ids.shape[1]
    tlogits = logits[:, -tgt_len:]
    denom = target_mask.sum().astype(jnp.float32)   # matches reference (includes BOS)

    # single top-k pass; top-5 / top-1 derived from its leading columns
    top10_idx = jax.lax.top_k(tlogits[:, :-1, :], 10)[1]      # (B, T-1, 10)
    hits = (top10_idx == target_ids[:, 1:, None]).astype(jnp.float32)
    mask_t = target_mask[..., :-1].astype(jnp.float32)

    top1_acc = (hits[..., 0] * mask_t).sum() / denom
    top5_acc = (hits[..., :5] * mask_t[..., None]).sum() / denom
    top10_acc = (hits * mask_t[..., None]).sum() / denom

    # TODO(synk): sample_hf (HF .generate autoregressive sampling) is inference-only
    # and not part of the forward pass; not implemented here.
    return {"loss": loss, "logits": logits,
            "top1_acc": top1_acc, "top5_acc": top5_acc, "top10_acc": top10_acc}


# ----------------------------- parameter init ------------------------------
def init_params(key):
    def normal(k, shape, std=0.02):
        return std * jax.random.normal(k, shape, dtype=jnp.float32)

    bf16 = jnp.bfloat16
    keys = jax.random.split(key, 2 + N_LAYERS * 7)
    embed = normal(keys[0], (VOCAB, HIDDEN)).at[PAD_ID].set(0.0)  # padding_idx row zeroed
    lm_head = normal(keys[1], (HIDDEN, VOCAB))
    lm_head_pad = jnp.zeros((HIDDEN, VOCAB_PAD), jnp.float32).at[:, :VOCAB].set(lm_head)

    wqkv, wo, wgu, wdown = [], [], [], []
    for li in range(N_LAYERS):
        ks = keys[2 + li * 7: 2 + (li + 1) * 7]
        wq = normal(ks[0], (HIDDEN, HIDDEN))
        wk = normal(ks[1], (HIDDEN, HIDDEN))
        wv = normal(ks[2], (HIDDEN, HIDDEN))
        wqkv.append(jnp.concatenate([wq, wk, wv], axis=-1))       # fused QKV
        wo.append(normal(ks[3], (HIDDEN, HIDDEN)))
        w_gate = normal(ks[4], (HIDDEN, INTERMEDIATE))
        w_up = normal(ks[5], (HIDDEN, INTERMEDIATE))
        wgu.append(jnp.concatenate([w_gate, w_up], axis=-1))      # fused gate|up
        wdown.append(normal(ks[6], (INTERMEDIATE, HIDDEN)))

    # MXU-side weights stored in bf16 (halves DMA, no in-kernel weight casts).
    return dict(
        embed=embed,
        in_norm=jnp.ones((N_LAYERS, 1, HIDDEN), jnp.float32),
        post_norm=jnp.ones((N_LAYERS, 1, HIDDEN), jnp.float32),
        wqkv=jnp.stack(wqkv).astype(bf16),
        wo=jnp.stack(wo).astype(bf16),
        wgu=jnp.stack(wgu).astype(bf16),
        wdown=jnp.stack(wdown).astype(bf16),
        final_norm=jnp.ones((1, HIDDEN), jnp.float32),
        lm_head_pad=lm_head_pad.astype(bf16),
    )


# --------------------------------- main -------------------------------------
if __name__ == "__main__":
    key = jax.random.PRNGKey(0)
    k_phone, k_target, k_params = jax.random.split(key, 3)

    B, PHONE_LEN, TARGET_LEN = 2, 5, 6
    phone_ids = jax.random.randint(k_phone, (B, PHONE_LEN), 0, PHONE_VOCAB,
                                   dtype=jnp.int32)
    target_ids = jax.random.randint(k_target, (B, TARGET_LEN), 0, TARGET_VOCAB,
                                    dtype=jnp.int32)
    phone_mask = jnp.ones((B, PHONE_LEN), jnp.int32).at[1, -1].set(0)
    target_mask = jnp.ones((B, TARGET_LEN), jnp.int32).at[1, -2:].set(0)

    params = init_params(k_params)

    fwd = jax.jit(functools.partial(valle_ar_forward, params))
    out = fwd(phone_ids, phone_mask, target_ids, target_mask)
    out = jax.block_until_ready(out)

    assert jnp.isfinite(out["loss"]), "non-finite loss"
    assert out["logits"].shape == (B, PHONE_LEN + 2 + TARGET_LEN + 2, VOCAB)
    print("KERNEL_OK")
</pallas_src>

<mosaic_0001>
module attributes {stable_mosaic.version = 11 : i64} {
  func.func @_fused_lm_kernel(%arg0: i32, %arg1: memref<1x15x32xf32, #tpu.memory_space<vmem>>, %arg2: memref<1x1x15xi32, #tpu.memory_space<vmem>>, %arg3: memref<15x32xf32, #tpu.memory_space<vmem>>, %arg4: memref<15x32xf32, #tpu.memory_space<vmem>>, %arg5: memref<32x32xbf16, #tpu.memory_space<vmem>>, %arg6: memref<2x1x32xf32, #tpu.memory_space<vmem>>, %arg7: memref<2x1x32xf32, #tpu.memory_space<vmem>>, %arg8: memref<2x32x96xbf16, #tpu.memory_space<vmem>>, %arg9: memref<2x32x32xbf16, #tpu.memory_space<vmem>>, %arg10: memref<2x32x128xbf16, #tpu.memory_space<vmem>>, %arg11: memref<2x64x32xbf16, #tpu.memory_space<vmem>>, %arg12: memref<1x32xf32, #tpu.memory_space<vmem>>, %arg13: memref<32x128xbf16, #tpu.memory_space<vmem>>, %arg14: memref<1x15x128xf32, #tpu.memory_space<vmem>>) attributes {dimension_semantics = [#tpu.dimension_semantics<parallel>], iteration_bounds = array<i64: 2>, scalar_prefetch = 0 : i64, scratch_operands = 0 : i64, tpu.core_type = #tpu.core_type<tc>, window_params = [{transform_indices = @transform_0, window_bounds = array<i64: 1, 15, 32>}, {transform_indices = @transform_1, window_bounds = array<i64: 1, 1, 15>}, {pipeline_mode = #tpu.pipeline_mode<synchronous>, transform_indices = @transform_2, window_bounds = array<i64: 15, 32>}, {pipeline_mode = #tpu.pipeline_mode<synchronous>, transform_indices = @transform_3, window_bounds = array<i64: 15, 32>}, {pipeline_mode = #tpu.pipeline_mode<synchronous>, transform_indices = @transform_4, window_bounds = array<i64: 32, 32>}, {pipeline_mode = #tpu.pipeline_mode<synchronous>, transform_indices = @transform_5, window_bounds = array<i64: 2, 1, 32>}, {pipeline_mode = #tpu.pipeline_mode<synchronous>, transform_indices = @transform_6, window_bounds = array<i64: 2, 1, 32>}, {pipeline_mode = #tpu.pipeline_mode<synchronous>, transform_indices = @transform_7, window_bounds = array<i64: 2, 32, 96>}, {pipeline_mode = #tpu.pipeline_mode<synchronous>, transform_indices = @transform_8, window_bounds = array<i64: 2, 32, 32>}, {pipeline_mode = #tpu.pipeline_mode<synchronous>, transform_indices = @transform_9, window_bounds = array<i64: 2, 32, 128>}, {pipeline_mode = #tpu.pipeline_mode<synchronous>, transform_indices = @transform_10, window_bounds = array<i64: 2, 64, 32>}, {pipeline_mode = #tpu.pipeline_mode<synchronous>, transform_indices = @transform_11, window_bounds = array<i64: 1, 32>}, {pipeline_mode = #tpu.pipeline_mode<synchronous>, transform_indices = @transform_12, window_bounds = array<i64: 32, 128>}, {transform_indices = @transform_13, window_bounds = array<i64: 1, 15, 128>}]} {
    %c0 = arith.constant 0 : index
    %c0_0 = arith.constant 0 : index
    %c0_1 = arith.constant 0 : index
    %0 = vector.load %arg1[%c0, %c0_0, %c0_1] : memref<1x15x32xf32, #tpu.memory_space<vmem>>, vector<1x15x32xf32>
    %1 = vector.shape_cast %0 : vector<1x15x32xf32> to vector<15x32xf32>
    %c0_2 = arith.constant 0 : index
    %c0_3 = arith.constant 0 : index
    %2 = vector.load %arg3[%c0_2, %c0_3] : memref<15x32xf32, #tpu.memory_space<vmem>>, vector<15x32xf32>
    %c0_4 = arith.constant 0 : index
    %c0_5 = arith.constant 0 : index
    %3 = vector.load %arg4[%c0_4, %c0_5] : memref<15x32xf32, #tpu.memory_space<vmem>>, vector<15x32xf32>
    %c0_6 = arith.constant 0 : index
    %c0_7 = arith.constant 0 : index
    %4 = vector.load %arg5[%c0_6, %c0_7] : memref<32x32xbf16, #tpu.memory_space<vmem>>, vector<32x32xbf16>
    %5 = tpu.iota {dimensions = array<i32: 0>} : vector<15x15xi32>
    %6 = tpu.iota {dimensions = array<i32: 1>} : vector<15x15xi32>
    %c0_8 = arith.constant 0 : index
    %c0_9 = arith.constant 0 : index
    %c0_10 = arith.constant 0 : index
    %7 = vector.load %arg2[%c0_8, %c0_9, %c0_10] : memref<1x1x15xi32, #tpu.memory_space<vmem>>, vector<1x1x15xi32>
    %8 = vector.shape_cast %7 : vector<1x1x15xi32> to vector<1x15xi32>
    %c0_i32 = arith.constant 0 : i32
    %9 = vector.broadcast %c0_i32 : i32 to vector<1x15xi32>
    %10 = arith.cmpi sgt, %8, %9 : vector<1x15xi32>
    %11 = arith.cmpi sle, %6, %5 : vector<15x15xi32>
    %12 = vector.broadcast %10 : vector<1x15xi1> to vector<15x15xi1>
    %13 = arith.andi %11, %12 : vector<15x15xi1>
    %cst = arith.constant 0.000000e+00 : f32
    %cst_11 = arith.constant -1.000000e+09 : f32
    %14 = vector.broadcast %cst : f32 to vector<15x15xf32>
    %15 = vector.broadcast %cst_11 : f32 to vector<15x15xf32>
    %16 = arith.select %13, %14, %15 : vector<15x15xi1>, vector<15x15xf32>
    %c0_12 = arith.constant 0 : index
    %c0_13 = arith.constant 0 : index
    %c0_14 = arith.constant 0 : index
    %17 = vector.load %arg6[%c0_12, %c0_13, %c0_14] : memref<2x1x32xf32, #tpu.memory_space<vmem>>, vector<1x1x32xf32>
    %18 = vector.shape_cast %17 : vector<1x1x32xf32> to vector<1x32xf32>
    %19 = arith.mulf %1, %1 : vector<15x32xf32>
    %cst_15 = arith.constant dense<0.000000e+00> : vector<15xf32>
    %20 = vector.multi_reduction <add>, %19, %cst_15 [1] : vector<15x32xf32> to vector<15xf32>
    %21 = vector.shape_cast %20 : vector<15xf32> to vector<15x1xf32>
    %cst_16 = arith.constant 3.200000e+01 : f32
    %22 = vector.broadcast %cst_16 : f32 to vector<15x1xf32>
    %23 = arith.divf %21, %22 : vector<15x1xf32>
    %cst_17 = arith.constant 9.99999997E-7 : f32
    %24 = vector.broadcast %cst_17 : f32 to vector<15x1xf32>
    %25 = arith.addf %23, %24 : vector<15x1xf32>
    %26 = math.rsqrt %25 : vector<15x1xf32>
    %27 = vector.broadcast %26 : vector<15x1xf32> to vector<15x32xf32>
    %28 = arith.mulf %1, %27 : vector<15x32xf32>
    %29 = vector.broadcast %18 : vector<1x32xf32> to vector<15x32xf32>
    %30 = arith.mulf %28, %29 : vector<15x32xf32>
    %c0_18 = arith.constant 0 : index
    %c0_19 = arith.constant 0 : index
    %c0_20 = arith.constant 0 : index
    %31 = vector.load %arg8[%c0_18, %c0_19, %c0_20] : memref<2x32x96xbf16, #tpu.memory_space<vmem>>, vector<1x32x96xbf16>
    %32 = vector.shape_cast %31 : vector<1x32x96xbf16> to vector<32x96xbf16>
    %33 = arith.truncf %30 : vector<15x32xf32> to vector<15x32xbf16>
    %cst_21 = arith.constant dense<0.000000e+00> : vector<15x96xf32>
    %34 = tpu.matmul %33, %32, %cst_21 {dimension_numbers = #tpu.dot_dimension_numbers<[1], [0], [0], [1], [0, 0, 1, 1], [], []>} : vector<15x32xbf16>, vector<32x96xbf16>, vector<15x96xf32> -> vector<15x96xf32>
    %35 = vector.extract_strided_slice %34 {offsets = [0, 0], sizes = [15, 32], strides = [1, 1]} : vector<15x96xf32> to vector<15x32xf32>
    %36 = vector.extract_strided_slice %34 {offsets = [0, 32], sizes = [15, 32], strides = [1, 1]} : vector<15x96xf32> to vector<15x32xf32>
    %37 = vector.extract_strided_slice %34 {offsets = [0, 64], sizes = [15, 32], strides = [1, 1]} : vector<15x96xf32> to vector<15x32xf32>
    %38 = arith.mulf %35, %2 : vector<15x32xf32>
    %39 = arith.truncf %35 : vector<15x32xf32> to vector<15x32xbf16>
    %cst_22 = arith.constant dense<0.000000e+00> : vector<15x32xf32>
    %40 = tpu.matmul %39, %4, %cst_22 {dimension_numbers = #tpu.dot_dimension_numbers<[1], [0], [0], [1], [0, 0, 1, 1], [], []>} : vector<15x32xbf16>, vector<32x32xbf16>, vector<15x32xf32> -> vector<15x32xf32>
    %41 = arith.mulf %40, %3 : vector<15x32xf32>
    %42 = arith.addf %38, %41 : vector<15x32xf32>
    %43 = arith.mulf %36, %2 : vector<15x32xf32>
    %44 = arith.truncf %36 : vector<15x32xf32> to vector<15x32xbf16>
    %cst_23 = arith.constant dense<0.000000e+00> : vector<15x32xf32>
    %45 = tpu.matmul %44, %4, %cst_23 {dimension_numbers = #tpu.dot_dimension_numbers<[1], [0], [0], [1], [0, 0, 1, 1], [], []>} : vector<15x32xbf16>, vector<32x32xbf16>, vector<15x32xf32> -> vector<15x32xf32>
    %46 = arith.mulf %45, %3 : vector<15x32xf32>
    %47 = arith.addf %43, %46 : vector<15x32xf32>
    %c0_24 = arith.constant 0 : index
    %c0_25 = arith.constant 0 : index
    %c0_26 = arith.constant 0 : index
    %48 = vector.load %arg9[%c0_24, %c0_25, %c0_26] : memref<2x32x32xbf16, #tpu.memory_space<vmem>>, vector<1x32x32xbf16>
    %49 = vector.shape_cast %48 : vector<1x32x32xbf16> to vector<32x32xbf16>
    %cst_27 = arith.constant 0.000000e+00 : f32
    %50 = vector.broadcast %cst_27 : f32 to vector<15x32xf32>
    %51 = vector.extract_strided_slice %42 {offsets = [0, 0], sizes = [15, 8], strides = [1, 1]} : vector<15x32xf32> to vector<15x8xf32>
    %52 = vector.extract_strided_slice %47 {offsets = [0, 0], sizes = [15, 8], strides = [1, 1]} : vector<15x32xf32> to vector<15x8xf32>
    %53 = vector.extract_strided_slice %37 {offsets = [0, 0], sizes = [15, 8], strides = [1, 1]} : vector<15x32xf32> to vector<15x8xf32>
    %54 = arith.truncf %51 : vector<15x8xf32> to vector<15x8xbf16>
    %55 = arith.truncf %52 : vector<15x8xf32> to vector<15x8xbf16>
    %cst_28 = arith.constant dense<0.000000e+00> : vector<15x15xf32>
    %56 = tpu.matmul %54, %55, %cst_28 {dimension_numbers = #tpu.dot_dimension_numbers<[1], [1], [0], [0], [0, 0, 1, 0], [], []>} : vector<15x8xbf16>, vector<15x8xbf16>, vector<15x15xf32> -> vector<15x15xf32>
    %cst_29 = arith.constant 0.353553385 : f32
    %57 = vector.broadcast %cst_29 : f32 to vector<15x15xf32>
    %58 = arith.mulf %56, %57 : vector<15x15xf32>
    %59 = arith.addf %58, %16 : vector<15x15xf32>
    %cst_30 = arith.constant dense<0xFF800000> : vector<15xf32>
    %60 = vector.multi_reduction <maximumf>, %59, %cst_30 [1] : vector<15x15xf32> to vector<15xf32>
    %61 = vector.shape_cast %60 : vector<15xf32> to vector<15x1xf32>
    %62 = vector.broadcast %61 : vector<15x1xf32> to vector<15x15xf32>
    %63 = arith.subf %59, %62 : vector<15x15xf32>
    %64 = math.exp %63 : vector<15x15xf32>
    %cst_31 = arith.constant dense<0.000000e+00> : vector<15xf32>
    %65 = vector.multi_reduction <add>, %64, %cst_31 [1] : vector<15x15xf32> to vector<15xf32>
    %66 = vector.shape_cast %65 : vector<15xf32> to vector<15x1xf32>
    %67 = tpu.reciprocal %66 {approx = true} : vector<15x1xf32> -> vector<15x1xf32>
    %68 = vector.broadcast %67 : vector<15x1xf32> to vector<15x15xf32>
    %69 = arith.mulf %64, %68 : vector<15x15xf32>
    %70 = arith.truncf %69 : vector<15x15xf32> to vector<15x15xbf16>
    %71 = arith.truncf %53 : vector<15x8xf32> to vector<15x8xbf16>
    %cst_32 = arith.constant dense<0.000000e+00> : vector<15x8xf32>
    %72 = tpu.matmul %70, %71, %cst_32 {dimension_numbers = #tpu.dot_dimension_numbers<[1], [0], [0], [1], [0, 0, 1, 1], [], []>} : vector<15x15xbf16>, vector<15x8xbf16>, vector<15x8xf32> -> vector<15x8xf32>
    %73 = vector.extract_strided_slice %49 {offsets = [0, 0], sizes = [8, 32], strides = [1, 1]} : vector<32x32xbf16> to vector<8x32xbf16>
    %74 = arith.truncf %72 : vector<15x8xf32> to vector<15x8xbf16>
    %cst_33 = arith.constant dense<0.000000e+00> : vector<15x32xf32>
    %75 = tpu.matmul %74, %73, %cst_33 {dimension_numbers = #tpu.dot_dimension_numbers<[1], [0], [0], [1], [0, 0, 1, 1], [], []>} : vector<15x8xbf16>, vector<8x32xbf16>, vector<15x32xf32> -> vector<15x32xf32>
    %76 = arith.addf %50, %75 : vector<15x32xf32>
    %77 = vector.extract_strided_slice %42 {offsets = [0, 8], sizes = [15, 8], strides = [1, 1]} : vector<15x32xf32> to vector<15x8xf32>
    %78 = vector.extract_strided_slice %47 {offsets = [0, 8], sizes = [15, 8], strides = [1, 1]} : vector<15x32xf32> to vector<15x8xf32>
    %79 = vector.extract_strided_slice %37 {offsets = [0, 8], sizes = [15, 8], strides = [1, 1]} : vector<15x32xf32> to vector<15x8xf32>
    %80 = arith.truncf %77 : vector<15x8xf32> to vector<15x8xbf16>
    %81 = arith.truncf %78 : vector<15x8xf32> to vector<15x8xbf16>
    %cst_34 = arith.constant dense<0.000000e+00> : vector<15x15xf32>
    %82 = tpu.matmul %80, %81, %cst_34 {dimension_numbers = #tpu.dot_dimension_numbers<[1], [1], [0], [0], [0, 0, 1, 0], [], []>} : vector<15x8xbf16>, vector<15x8xbf16>, vector<15x15xf32> -> vector<15x15xf32>
    %cst_35 = arith.constant 0.353553385 : f32
    %83 = vector.broadcast %cst_35 : f32 to vector<15x15xf32>
    %84 = arith.mulf %82, %83 : vector<15x15xf32>
    %85 = arith.addf %84, %16 : vector<15x15xf32>
    %cst_36 = arith.constant dense<0xFF800000> : vector<15xf32>
    %86 = vector.multi_reduction <maximumf>, %85, %cst_36 [1] : vector<15x15xf32> to vector<15xf32>
    %87 = vector.shape_cast %86 : vector<15xf32> to vector<15x1xf32>
    %88 = vector.broadcast %87 : vector<15x1xf32> to vector<15x15xf32>
    %89 = arith.subf %85, %88 : vector<15x15xf32>
    %90 = math.exp %89 : vector<15x15xf32>
    %cst_37 = arith.constant dense<0.000000e+00> : vector<15xf32>
    %91 = vector.multi_reduction <add>, %90, %cst_37 [1] : vector<15x15xf32> to vector<15xf32>
    %92 = vector.shape_cast %91 : vector<15xf32> to vector<15x1xf32>
    %93 = tpu.reciprocal %92 {approx = true} : vector<15x1xf32> -> vector<15x1xf32>
    %94 = vector.broadcast %93 : vector<15x1xf32> to vector<15x15xf32>
    %95 = arith.mulf %90, %94 : vector<15x15xf32>
    %96 = arith.truncf %95 : vector<15x15xf32> to vector<15x15xbf16>
    %97 = arith.truncf %79 : vector<15x8xf32> to vector<15x8xbf16>
    %cst_38 = arith.constant dense<0.000000e+00> : vector<15x8xf32>
    %98 = tpu.matmul %96, %97, %cst_38 {dimension_numbers = #tpu.dot_dimension_numbers<[1], [0], [0], [1], [0, 0, 1, 1], [], []>} : vector<15x15xbf16>, vector<15x8xbf16>, vector<15x8xf32> -> vector<15x8xf32>
    %99 = vector.extract_strided_slice %49 {offsets = [8, 0], sizes = [8, 32], strides = [1, 1]} : vector<32x32xbf16> to vector<8x32xbf16>
    %100 = arith.truncf %98 : vector<15x8xf32> to vector<15x8xbf16>
    %cst_39 = arith.constant dense<0.000000e+00> : vector<15x32xf32>
    %101 = tpu.matmul %100, %99, %cst_39 {dimension_numbers = #tpu.dot_dimension_numbers<[1], [0], [0], [1], [0, 0, 1, 1], [], []>} : vector<15x8xbf16>, vector<8x32xbf16>, vector<15x32xf32> -> vector<15x32xf32>
    %102 = arith.addf %76, %101 : vector<15x32xf32>
    %103 = vector.extract_strided_slice %42 {offsets = [0, 16], sizes = [15, 8], strides = [1, 1]} : vector<15x32xf32> to vector<15x8xf32>
    %104 = vector.extract_strided_slice %47 {offsets = [0, 16], sizes = [15, 8], strides = [1, 1]} : vector<15x32xf32> to vector<15x8xf32>
    %105 = vector.extract_strided_slice %37 {offsets = [0, 16], sizes = [15, 8], strides = [1, 1]} : vector<15x32xf32> to vector<15x8xf32>
    %106 = arith.truncf %103 : vector<15x8xf32> to vector<15x8xbf16>
    %107 = arith.truncf %104 : vector<15x8xf32> to vector<15x8xbf16>
    %cst_40 = arith.constant dense<0.000000e+00> : vector<15x15xf32>
    %108 = tpu.matmul %106, %107, %cst_40 {dimension_numbers = #tpu.dot_dimension_numbers<[1], [1], [0], [0], [0, 0, 1, 0], [], []>} : vector<15x8xbf16>, vector<15x8xbf16>, vector<15x15xf32> -> vector<15x15xf32>
    %cst_41 = arith.constant 0.353553385 : f32
    %109 = vector.broadcast %cst_41 : f32 to vector<15x15xf32>
    %110 = arith.mulf %108, %109 : vector<15x15xf32>
    %111 = arith.addf %110, %16 : vector<15x15xf32>
    %cst_42 = arith.constant dense<0xFF800000> : vector<15xf32>
    %112 = vector.multi_reduction <maximumf>, %111, %cst_42 [1] : vector<15x15xf32> to vector<15xf32>
    %113 = vector.shape_cast %112 : vector<15xf32> to vector<15x1xf32>
    %114 = vector.broadcast %113 : vector<15x1xf32> to vector<15x15xf32>
    %115 = arith.subf %111, %114 : vector<15x15xf32>
    %116 = math.exp %115 : vector<15x15xf32>
    %cst_43 = arith.constant dense<0.000000e+00> : vector<15xf32>
    %117 = vector.multi_reduction <add>, %116, %cst_43 [1] : vector<15x15xf32> to vector<15xf32>
    %118 = vector.shape_cast %117 : vector<15xf32> to vector<15x1xf32>
    %119 = tpu.reciprocal %118 {approx = true} : vector<15x1xf32> -> vector<15x1xf32>
    %120 = vector.broadcast %119 : vector<15x1xf32> to vector<15x15xf32>
    %121 = arith.mulf %116, %120 : vector<15x15xf32>
    %122 = arith.truncf %121 : vector<15x15xf32> to vector<15x15xbf16>
    %123 = arith.truncf %105 : vector<15x8xf32> to vector<15x8xbf16>
    %cst_44 = arith.constant dense<0.000000e+00> : vector<15x8xf32>
    %124 = tpu.matmul %122, %123, %cst_44 {dimension_numbers = #tpu.dot_dimension_numbers<[1], [0], [0], [1], [0, 0, 1, 1], [], []>} : vector<15x15xbf16>, vector<15x8xbf16>, vector<15x8xf32> -> vector<15x8xf32>
    %125 = vector.extract_strided_slice %49 {offsets = [16, 0], sizes = [8, 32], strides = [1, 1]} : vector<32x32xbf16> to vector<8x32xbf16>
    %126 = arith.truncf %124 : vector<15x8xf32> to vector<15x8xbf16>
    %cst_45 = arith.constant dense<0.000000e+00> : vector<15x32xf32>
    %127 = tpu.matmul %126, %125, %cst_45 {dimension_numbers = #tpu.dot_dimension_numbers<[1], [0], [0], [1], [0, 0, 1, 1], [], []>} : vector<15x8xbf16>, vector<8x32xbf16>, vector<15x32xf32> -> vector<15x32xf32>
    %128 = arith.addf %102, %127 : vector<15x32xf32>
    %129 = vector.extract_strided_slice %42 {offsets = [0, 24], sizes = [15, 8], strides = [1, 1]} : vector<15x32xf32> to vector<15x8xf32>
    %130 = vector.extract_strided_slice %47 {offsets = [0, 24], sizes = [15, 8], strides = [1, 1]} : vector<15x32xf32> to vector<15x8xf32>
    %131 = vector.extract_strided_slice %37 {offsets = [0, 24], sizes = [15, 8], strides = [1, 1]} : vector<15x32xf32> to vector<15x8xf32>
    %132 = arith.truncf %129 : vector<15x8xf32> to vector<15x8xbf16>
    %133 = arith.truncf %130 : vector<15x8xf32> to vector<15x8xbf16>
    %cst_46 = arith.constant dense<0.000000e+00> : vector<15x15xf32>
    %134 = tpu.matmul %132, %133, %cst_46 {dimension_numbers = #tpu.dot_dimension_numbers<[1], [1], [0], [0], [0, 0, 1, 0], [], []>} : vector<15x8xbf16>, vector<15x8xbf16>, vector<15x15xf32> -> vector<15x15xf32>
    %cst_47 = arith.constant 0.353553385 : f32
    %135 = vector.broadcast %cst_47 : f32 to vector<15x15xf32>
    %136 = arith.mulf %134, %135 : vector<15x15xf32>
    %137 = arith.addf %136, %16 : vector<15x15xf32>
    %cst_48 = arith.constant dense<0xFF800000> : vector<15xf32>
    %138 = vector.multi_reduction <maximumf>, %137, %cst_48 [1] : vector<15x15xf32> to vector<15xf32>
    %139 = vector.shape_cast %138 : vector<15xf32> to vector<15x1xf32>
    %140 = vector.broadcast %139 : vector<15x1xf32> to vector<15x15xf32>
    %141 = arith.subf %137, %140 : vector<15x15xf32>
    %142 = math.exp %141 : vector<15x15xf32>
    %cst_49 = arith.constant dense<0.000000e+00> : vector<15xf32>
    %143 = vector.multi_reduction <add>, %142, %cst_49 [1] : vector<15x15xf32> to vector<15xf32>
    %144 = vector.shape_cast %143 : vector<15xf32> to vector<15x1xf32>
    %145 = tpu.reciprocal %144 {approx = true} : vector<15x1xf32> -> vector<15x1xf32>
    %146 = vector.broadcast %145 : vector<15x1xf32> to vector<15x15xf32>
    %147 = arith.mulf %142, %146 : vector<15x15xf32>
    %148 = arith.truncf %147 : vector<15x15xf32> to vector<15x15xbf16>
    %149 = arith.truncf %131 : vector<15x8xf32> to vector<15x8xbf16>
    %cst_50 = arith.constant dense<0.000000e+00> : vector<15x8xf32>
    %150 = tpu.matmul %148, %149, %cst_50 {dimension_numbers = #tpu.dot_dimension_numbers<[1], [0], [0], [1], [0, 0, 1, 1], [], []>} : vector<15x15xbf16>, vector<15x8xbf16>, vector<15x8xf32> -> vector<15x8xf32>
    %151 = vector.extract_strided_slice %49 {offsets = [24, 0], sizes = [8, 32], strides = [1, 1]} : vector<32x32xbf16> to vector<8x32xbf16>
    %152 = arith.truncf %150 : vector<15x8xf32> to vector<15x8xbf16>
    %cst_51 = arith.constant dense<0.000000e+00> : vector<15x32xf32>
    %153 = tpu.matmul %152, %151, %cst_51 {dimension_numbers = #tpu.dot_dimension_numbers<[1], [0], [0], [1], [0, 0, 1, 1], [], []>} : vector<15x8xbf16>, vector<8x32xbf16>, vector<15x32xf32> -> vector<15x32xf32>
    %154 = arith.addf %128, %153 : vector<15x32xf32>
    %155 = arith.addf %1, %154 : vector<15x32xf32>
    %c0_52 = arith.constant 0 : index
    %c0_53 = arith.constant 0 : index
    %c0_54 = arith.constant 0 : index
    %156 = vector.load %arg7[%c0_52, %c0_53, %c0_54] : memref<2x1x32xf32, #tpu.memory_space<vmem>>, vector<1x1x32xf32>
    %157 = vector.shape_cast %156 : vector<1x1x32xf32> to vector<1x32xf32>
    %158 = arith.mulf %155, %155 : vector<15x32xf32>
    %cst_55 = arith.constant dense<0.000000e+00> : vector<15xf32>
    %159 = vector.multi_reduction <add>, %158, %cst_55 [1] : vector<15x32xf32> to vector<15xf32>
    %160 = vector.shape_cast %159 : vector<15xf32> to vector<15x1xf32>
    %cst_56 = arith.constant 3.200000e+01 : f32
    %161 = vector.broadcast %cst_56 : f32 to vector<15x1xf32>
    %162 = arith.divf %160, %161 : vector<15x1xf32>
    %cst_57 = arith.constant 9.99999997E-7 : f32
    %163 = vector.broadcast %cst_57 : f32 to vector<15x1xf32>
    %164 = arith.addf %162, %163 : vector<15x1xf32>
    %165 = math.rsqrt %164 : vector<15x1xf32>
    %166 = vector.broadcast %165 : vector<15x1xf32> to vector<15x32xf32>
    %167 = arith.mulf %155, %166 : vector<15x32xf32>
    %168 = vector.broadcast %157 : vector<1x32xf32> to vector<15x32xf32>
    %169 = arith.mulf %167, %168 : vector<15x32xf32>
    %c0_58 = arith.constant 0 : index
    %c0_59 = arith.constant 0 : index
    %c0_60 = arith.constant 0 : index
    %170 = vector.load %arg10[%c0_58, %c0_59, %c0_60] : memref<2x32x128xbf16, #tpu.memory_space<vmem>>, vector<1x32x128xbf16>
    %171 = vector.shape_cast %170 : vector<1x32x128xbf16> to vector<32x128xbf16>
    %172 = arith.truncf %169 : vector<15x32xf32> to vector<15x32xbf16>
    %cst_61 = arith.constant dense<0.000000e+00> : vector<15x128xf32>
    %173 = tpu.matmul %172, %171, %cst_61 {dimension_numbers = #tpu.dot_dimension_numbers<[1], [0], [0], [1], [0, 0, 1, 1], [], []>} : vector<15x32xbf16>, vector<32x128xbf16>, vector<15x128xf32> -> vector<15x128xf32>
    %174 = vector.extract_strided_slice %173 {offsets = [0, 0], sizes = [15, 64], strides = [1, 1]} : vector<15x128xf32> to vector<15x64xf32>
    %175 = vector.extract_strided_slice %173 {offsets = [0, 64], sizes = [15, 64], strides = [1, 1]} : vector<15x128xf32> to vector<15x64xf32>
    %176 = arith.negf %174 : vector<15x64xf32>
    %177 = math.exp %176 : vector<15x64xf32>
    %cst_62 = arith.constant 1.000000e+00 : f32
    %178 = vector.broadcast %cst_62 : f32 to vector<15x64xf32>
    %179 = arith.addf %178, %177 : vector<15x64xf32>
    %180 = arith.divf %178, %179 : vector<15x64xf32>
    %181 = arith.mulf %174, %180 : vector<15x64xf32>
    %182 = arith.mulf %181, %175 : vector<15x64xf32>
    %c0_63 = arith.constant 0 : index
    %c0_64 = arith.constant 0 : index
    %c0_65 = arith.constant 0 : index
    %183 = vector.load %arg11[%c0_63, %c0_64, %c0_65] : memref<2x64x32xbf16, #tpu.memory_space<vmem>>, vector<1x64x32xbf16>
    %184 = vector.shape_cast %183 : vector<1x64x32xbf16> to vector<64x32xbf16>
    %185 = arith.truncf %182 : vector<15x64xf32> to vector<15x64xbf16>
    %cst_66 = arith.constant dense<0.000000e+00> : vector<15x32xf32>
    %186 = tpu.matmul %185, %184, %cst_66 {dimension_numbers = #tpu.dot_dimension_numbers<[1], [0], [0], [1], [0, 0, 1, 1], [], []>} : vector<15x64xbf16>, vector<64x32xbf16>, vector<15x32xf32> -> vector<15x32xf32>
    %187 = arith.addf %155, %186 : vector<15x32xf32>
    %c1 = arith.constant 1 : index
    %c0_67 = arith.constant 0 : index
    %c0_68 = arith.constant 0 : index
    %188 = vector.load %arg6[%c1, %c0_67, %c0_68] : memref<2x1x32xf32, #tpu.memory_space<vmem>>, vector<1x1x32xf32>
    %189 = vector.shape_cast %188 : vector<1x1x32xf32> to vector<1x32xf32>
    %190 = arith.mulf %187, %187 : vector<15x32xf32>
    %cst_69 = arith.constant dense<0.000000e+00> : vector<15xf32>
    %191 = vector.multi_reduction <add>, %190, %cst_69 [1] : vector<15x32xf32> to vector<15xf32>
    %192 = vector.shape_cast %191 : vector<15xf32> to vector<15x1xf32>
    %cst_70 = arith.constant 3.200000e+01 : f32
    %193 = vector.broadcast %cst_70 : f32 to vector<15x1xf32>
    %194 = arith.divf %192, %193 : vector<15x1xf32>
    %cst_71 = arith.constant 9.99999997E-7 : f32
    %195 = vector.broadcast %cst_71 : f32 to vector<15x1xf32>
    %196 = arith.addf %194, %195 : vector<15x1xf32>
    %197 = math.rsqrt %196 : vector<15x1xf32>
    %198 = vector.broadcast %197 : vector<15x1xf32> to vector<15x32xf32>
    %199 = arith.mulf %187, %198 : vector<15x32xf32>
    %200 = vector.broadcast %189 : vector<1x32xf32> to vector<15x32xf32>
    %201 = arith.mulf %199, %200 : vector<15x32xf32>
    %c1_72 = arith.constant 1 : index
    %c0_73 = arith.constant 0 : index
    %c0_74 = arith.constant 0 : index
    %202 = vector.load %arg8[%c1_72, %c0_73, %c0_74] : memref<2x32x96xbf16, #tpu.memory_space<vmem>>, vector<1x32x96xbf16>
    %203 = vector.shape_cast %202 : vector<1x32x96xbf16> to vector<32x96xbf16>
    %204 = arith.truncf %201 : vector<15x32xf32> to vector<15x32xbf16>
    %cst_75 = arith.constant dense<0.000000e+00> : vector<15x96xf32>
    %205 = tpu.matmul %204, %203, %cst_75 {dimension_numbers = #tpu.dot_dimension_numbers<[1], [0], [0], [1], [0, 0, 1, 1], [], []>} : vector<15x32xbf16>, vector<32x96xbf16>, vector<15x96xf32> -> vector<15x96xf32>
    %206 = vector.extract_strided_slice %205 {offsets = [0, 0], sizes = [15, 32], strides = [1, 1]} : vector<15x96xf32> to vector<15x32xf32>
    %207 = vector.extract_strided_slice %205 {offsets = [0, 32], sizes = [15, 32], strides = [1, 1]} : vector<15x96xf32> to vector<15x32xf32>
    %208 = vector.extract_strided_slice %205 {offsets = [0, 64], sizes = [15, 32], strides = [1, 1]} : vector<15x96xf32> to vector<15x32xf32>
    %209 = arith.mulf %206, %2 : vector<15x32xf32>
    %210 = arith.truncf %206 : vector<15x32xf32> to vector<15x32xbf16>
    %cst_76 = arith.constant dense<0.000000e+00> : vector<15x32xf32>
    %211 = tpu.matmul %210, %4, %cst_76 {dimension_numbers = #tpu.dot_dimension_numbers<[1], [0], [0], [1], [0, 0, 1, 1], [], []>} : vector<15x32xbf16>, vector<32x32xbf16>, vector<15x32xf32> -> vector<15x32xf32>
    %212 = arith.mulf %211, %3 : vector<15x32xf32>
    %213 = arith.addf %209, %212 : vector<15x32xf32>
    %214 = arith.mulf %207, %2 : vector<15x32xf32>
    %215 = arith.truncf %207 : vector<15x32xf32> to vector<15x32xbf16>
    %cst_77 = arith.constant dense<0.000000e+00> : vector<15x32xf32>
    %216 = tpu.matmul %215, %4, %cst_77 {dimension_numbers = #tpu.dot_dimension_numbers<[1], [0], [0], [1], [0, 0, 1, 1], [], []>} : vector<15x32xbf16>, vector<32x32xbf16>, vector<15x32xf32> -> vector<15x32xf32>
    %217 = arith.mulf %216, %3 : vector<15x32xf32>
    %218 = arith.addf %214, %217 : vector<15x32xf32>
    %c1_78 = arith.constant 1 : index
    %c0_79 = arith.constant 0 : index
    %c0_80 = arith.constant 0 : index
    %219 = vector.load %arg9[%c1_78, %c0_79, %c0_80] : memref<2x32x32xbf16, #tpu.memory_space<vmem>>, vector<1x32x32xbf16>
    %220 = vector.shape_cast %219 : vector<1x32x32xbf16> to vector<32x32xbf16>
    %cst_81 = arith.constant 0.000000e+00 : f32
    %221 = vector.broadcast %cst_81 : f32 to vector<15x32xf32>
    %222 = vector.extract_strided_slice %213 {offsets = [0, 0], sizes = [15, 8], strides = [1, 1]} : vector<15x32xf32> to vector<15x8xf32>
    %223 = vector.extract_strided_slice %218 {offsets = [0, 0], sizes = [15, 8], strides = [1, 1]} : vector<15x32xf32> to vector<15x8xf32>
    %224 = vector.extract_strided_slice %208 {offsets = [0, 0], sizes = [15, 8], strides = [1, 1]} : vector<15x32xf32> to vector<15x8xf32>
    %225 = arith.truncf %222 : vector<15x8xf32> to vector<15x8xbf16>
    %226 = arith.truncf %223 : vector<15x8xf32> to vector<15x8xbf16>
    %cst_82 = arith.constant dense<0.000000e+00> : vector<15x15xf32>
    %227 = tpu.matmul %225, %226, %cst_82 {dimension_numbers = #tpu.dot_dimension_numbers<[1], [1], [0], [0], [0, 0, 1, 0], [], []>} : vector<15x8xbf16>, vector<15x8xbf16>, vector<15x15xf32> -> vector<15x15xf32>
    %cst_83 = arith.constant 0.353553385 : f32
    %228 = vector.broadcast %cst_83 : f32 to vector<15x15xf32>
    %229 = arith.mulf %227, %228 : vector<15x15xf32>
    %230 = arith.addf %229, %16 : vector<15x15xf32>
    %cst_84 = arith.constant dense<0xFF800000> : vector<15xf32>
    %231 = vector.multi_reduction <maximumf>, %230, %cst_84 [1] : vector<15x15xf32> to vector<15xf32>
    %232 = vector.shape_cast %231 : vector<15xf32> to vector<15x1xf32>
    %233 = vector.broadcast %232 : vector<15x1xf32> to vector<15x15xf32>
    %234 = arith.subf %230, %233 : vector<15x15xf32>
    %235 = math.exp %234 : vector<15x15xf32>
    %cst_85 = arith.constant dense<0.000000e+00> : vector<15xf32>
    %236 = vector.multi_reduction <add>, %235, %cst_85 [1] : vector<15x15xf32> to vector<15xf32>
    %237 = vector.shape_cast %236 : vector<15xf32> to vector<15x1xf32>
    %238 = tpu.reciprocal %237 {approx = true} : vector<15x1xf32> -> vector<15x1xf32>
    %239 = vector.broadcast %238 : vector<15x1xf32> to vector<15x15xf32>
    %240 = arith.mulf %235, %239 : vector<15x15xf32>
    %241 = arith.truncf %240 : vector<15x15xf32> to vector<15x15xbf16>
    %242 = arith.truncf %224 : vector<15x8xf32> to vector<15x8xbf16>
    %cst_86 = arith.constant dense<0.000000e+00> : vector<15x8xf32>
    %243 = tpu.matmul %241, %242, %cst_86 {dimension_numbers = #tpu.dot_dimension_numbers<[1], [0], [0], [1], [0, 0, 1, 1], [], []>} : vector<15x15xbf16>, vector<15x8xbf16>, vector<15x8xf32> -> vector<15x8xf32>
    %244 = vector.extract_strided_slice %220 {offsets = [0, 0], sizes = [8, 32], strides = [1, 1]} : vector<32x32xbf16> to vector<8x32xbf16>
    %245 = arith.truncf %243 : vector<15x8xf32> to vector<15x8xbf16>
    %cst_87 = arith.constant dense<0.000000e+00> : vector<15x32xf32>
    %246 = tpu.matmul %245, %244, %cst_87 {dimension_numbers = #tpu.dot_dimension_numbers<[1], [0], [0], [1], [0, 0, 1, 1], [], []>} : vector<15x8xbf16>, vector<8x32xbf16>, vector<15x32xf32> -> vector<15x32xf32>
    %247 = arith.addf %221, %246 : vector<15x32xf32>
    %248 = vector.extract_strided_slice %213 {offsets = [0, 8], sizes = [15, 8], strides = [1, 1]} : vector<15x32xf32> to vector<15x8xf32>
    %249 = vector.extract_strided_slice %218 {offsets = [0, 8], sizes = [15, 8], strides = [1, 1]} : vector<15x32xf32> to vector<15x8xf32>
    %250 = vector.extract_strided_slice %208 {offsets = [0, 8], sizes = [15, 8], strides = [1, 1]} : vector<15x32xf32> to vector<15x8xf32>
    %251 = arith.truncf %248 : vector<15x8xf32> to vector<15x8xbf16>
    %252 = arith.truncf %249 : vector<15x8xf32> to vector<15x8xbf16>
    %cst_88 = arith.constant dense<0.000000e+00> : vector<15x15xf32>
    %253 = tpu.matmul %251, %252, %cst_88 {dimension_numbers = #tpu.dot_dimension_numbers<[1], [1], [0], [0], [0, 0, 1, 0], [], []>} : vector<15x8xbf16>, vector<15x8xbf16>, vector<15x15xf32> -> vector<15x15xf32>
    %cst_89 = arith.constant 0.353553385 : f32
    %254 = vector.broadcast %cst_89 : f32 to vector<15x15xf32>
    %255 = arith.mulf %253, %254 : vector<15x15xf32>
    %256 = arith.addf %255, %16 : vector<15x15xf32>
    %cst_90 = arith.constant dense<0xFF800000> : vector<15xf32>
    %257 = vector.multi_reduction <maximumf>, %256, %cst_90 [1] : vector<15x15xf32> to vector<15xf32>
    %258 = vector.shape_cast %257 : vector<15xf32> to vector<15x1xf32>
    %259 = vector.broadcast %258 : vector<15x1xf32> to vector<15x15xf32>
    %260 = arith.subf %256, %259 : vector<15x15xf32>
    %261 = math.exp %260 : vector<15x15xf32>
    %cst_91 = arith.constant dense<0.000000e+00> : vector<15xf32>
    %262 = vector.multi_reduction <add>, %261, %cst_91 [1] : vector<15x15xf32> to vector<15xf32>
    %263 = vector.shape_cast %262 : vector<15xf32> to vector<15x1xf32>
    %264 = tpu.reciprocal %263 {approx = true} : vector<15x1xf32> -> vector<15x1xf32>
    %265 = vector.broadcast %264 : vector<15x1xf32> to vector<15x15xf32>
    %266 = arith.mulf %261, %265 : vector<15x15xf32>
    %267 = arith.truncf %266 : vector<15x15xf32> to vector<15x15xbf16>
    %268 = arith.truncf %250 : vector<15x8xf32> to vector<15x8xbf16>
    %cst_92 = arith.constant dense<0.000000e+00> : vector<15x8xf32>
    %269 = tpu.matmul %267, %268, %cst_92 {dimension_numbers = #tpu.dot_dimension_numbers<[1], [0], [0], [1], [0, 0, 1, 1], [], []>} : vector<15x15xbf16>, vector<15x8xbf16>, vector<15x8xf32> -> vector<15x8xf32>
    %270 = vector.extract_strided_slice %220 {offsets = [8, 0], sizes = [8, 32], strides = [1, 1]} : vector<32x32xbf16> to vector<8x32xbf16>
    %271 = arith.truncf %269 : vector<15x8xf32> to vector<15x8xbf16>
    %cst_93 = arith.constant dense<0.000000e+00> : vector<15x32xf32>
    %272 = tpu.matmul %271, %270, %cst_93 {dimension_numbers = #tpu.dot_dimension_numbers<[1], [0], [0], [1], [0, 0, 1, 1], [], []>} : vector<15x8xbf16>, vector<8x32xbf16>, vector<15x32xf32> -> vector<15x32xf32>
    %273 = arith.addf %247, %272 : vector<15x32xf32>
    %274 = vector.extract_strided_slice %213 {offsets = [0, 16], sizes = [15, 8], strides = [1, 1]} : vector<15x32xf32> to vector<15x8xf32>
    %275 = vector.extract_strided_slice %218 {offsets = [0, 16], sizes = [15, 8], strides = [1, 1]} : vector<15x32xf32> to vector<15x8xf32>
    %276 = vector.extract_strided_slice %208 {offsets = [0, 16], sizes = [15, 8], strides = [1, 1]} : vector<15x32xf32> to vector<15x8xf32>
    %277 = arith.truncf %274 : vector<15x8xf32> to vector<15x8xbf16>
    %278 = arith.truncf %275 : vector<15x8xf32> to vector<15x8xbf16>
    %cst_94 = arith.constant dense<0.000000e+00> : vector<15x15xf32>
    %279 = tpu.matmul %277, %278, %cst_94 {dimension_numbers = #tpu.dot_dimension_numbers<[1], [1], [0], [0], [0, 0, 1, 0], [], []>} : vector<15x8xbf16>, vector<15x8xbf16>, vector<15x15xf32> -> vector<15x15xf32>
    %cst_95 = arith.constant 0.353553385 : f32
    %280 = vector.broadcast %cst_95 : f32 to vector<15x15xf32>
    %281 = arith.mulf %279, %280 : vector<15x15xf32>
    %282 = arith.addf %281, %16 : vector<15x15xf32>
    %cst_96 = arith.constant dense<0xFF800000> : vector<15xf32>
    %283 = vector.multi_reduction <maximumf>, %282, %cst_96 [1] : vector<15x15xf32> to vector<15xf32>
    %284 = vector.shape_cast %283 : vector<15xf32> to vector<15x1xf32>
    %285 = vector.broadcast %284 : vector<15x1xf32> to vector<15x15xf32>
    %286 = arith.subf %282, %285 : vector<15x15xf32>
    %287 = math.exp %286 : vector<15x15xf32>
    %cst_97 = arith.constant dense<0.000000e+00> : vector<15xf32>
    %288 = vector.multi_reduction <add>, %287, %cst_97 [1] : vector<15x15xf32> to vector<15xf32>
    %289 = vector.shape_cast %288 : vector<15xf32> to vector<15x1xf32>
    %290 = tpu.reciprocal %289 {approx = true} : vector<15x1xf32> -> vector<15x1xf32>
    %291 = vector.broadcast %290 : vector<15x1xf32> to vector<15x15xf32>
    %292 = arith.mulf %287, %291 : vector<15x15xf32>
    %293 = arith.truncf %292 : vector<15x15xf32> to vector<15x15xbf16>
    %294 = arith.truncf %276 : vector<15x8xf32> to vector<15x8xbf16>
    %cst_98 = arith.constant dense<0.000000e+00> : vector<15x8xf32>
    %295 = tpu.matmul %293, %294, %cst_98 {dimension_numbers = #tpu.dot_dimension_numbers<[1], [0], [0], [1], [0, 0, 1, 1], [], []>} : vector<15x15xbf16>, vector<15x8xbf16>, vector<15x8xf32> -> vector<15x8xf32>
    %296 = vector.extract_strided_slice %220 {offsets = [16, 0], sizes = [8, 32], strides = [1, 1]} : vector<32x32xbf16> to vector<8x32xbf16>
    %297 = arith.truncf %295 : vector<15x8xf32> to vector<15x8xbf16>
    %cst_99 = arith.constant dense<0.000000e+00> : vector<15x32xf32>
    %298 = tpu.matmul %297, %296, %cst_99 {dimension_numbers = #tpu.dot_dimension_numbers<[1], [0], [0], [1], [0, 0, 1, 1], [], []>} : vector<15x8xbf16>, vector<8x32xbf16>, vector<15x32xf32> -> vector<15x32xf32>
    %299 = arith.addf %273, %298 : vector<15x32xf32>
    %300 = vector.extract_strided_slice %213 {offsets = [0, 24], sizes = [15, 8], strides = [1, 1]} : vector<15x32xf32> to vector<15x8xf32>
    %301 = vector.extract_strided_slice %218 {offsets = [0, 24], sizes = [15, 8], strides = [1, 1]} : vector<15x32xf32> to vector<15x8xf32>
    %302 = vector.extract_strided_slice %208 {offsets = [0, 24], sizes = [15, 8], strides = [1, 1]} : vector<15x32xf32> to vector<15x8xf32>
    %303 = arith.truncf %300 : vector<15x8xf32> to vector<15x8xbf16>
    %304 = arith.truncf %301 : vector<15x8xf32> to vector<15x8xbf16>
    %cst_100 = arith.constant dense<0.000000e+00> : vector<15x15xf32>
    %305 = tpu.matmul %303, %304, %cst_100 {dimension_numbers = #tpu.dot_dimension_numbers<[1], [1], [0], [0], [0, 0, 1, 0], [], []>} : vector<15x8xbf16>, vector<15x8xbf16>, vector<15x15xf32> -> vector<15x15xf32>
    %cst_101 = arith.constant 0.353553385 : f32
    %306 = vector.broadcast %cst_101 : f32 to vector<15x15xf32>
    %307 = arith.mulf %305, %306 : vector<15x15xf32>
    %308 = arith.addf %307, %16 : vector<15x15xf32>
    %cst_102 = arith.constant dense<0xFF800000> : vector<15xf32>
    %309 = vector.multi_reduction <maximumf>, %308, %cst_102 [1] : vector<15x15xf32> to vector<15xf32>
    %310 = vector.shape_cast %309 : vector<15xf32> to vector<15x1xf32>
    %311 = vector.broadcast %310 : vector<15x1xf32> to vector<15x15xf32>
    %312 = arith.subf %308, %311 : vector<15x15xf32>
    %313 = math.exp %312 : vector<15x15xf32>
    %cst_103 = arith.constant dense<0.000000e+00> : vector<15xf32>
    %314 = vector.multi_reduction <add>, %313, %cst_103 [1] : vector<15x15xf32> to vector<15xf32>
    %315 = vector.shape_cast %314 : vector<15xf32> to vector<15x1xf32>
    %316 = tpu.reciprocal %315 {approx = true} : vector<15x1xf32> -> vector<15x1xf32>
    %317 = vector.broadcast %316 : vector<15x1xf32> to vector<15x15xf32>
    %318 = arith.mulf %313, %317 : vector<15x15xf32>
    %319 = arith.truncf %318 : vector<15x15xf32> to vector<15x15xbf16>
    %320 = arith.truncf %302 : vector<15x8xf32> to vector<15x8xbf16>
    %cst_104 = arith.constant dense<0.000000e+00> : vector<15x8xf32>
    %321 = tpu.matmul %319, %320, %cst_104 {dimension_numbers = #tpu.dot_dimension_numbers<[1], [0], [0], [1], [0, 0, 1, 1], [], []>} : vector<15x15xbf16>, vector<15x8xbf16>, vector<15x8xf32> -> vector<15x8xf32>
    %322 = vector.extract_strided_slice %220 {offsets = [24, 0], sizes = [8, 32], strides = [1, 1]} : vector<32x32xbf16> to vector<8x32xbf16>
    %323 = arith.truncf %321 : vector<15x8xf32> to vector<15x8xbf16>
    %cst_105 = arith.constant dense<0.000000e+00> : vector<15x32xf32>
    %324 = tpu.matmul %323, %322, %cst_105 {dimension_numbers = #tpu.dot_dimension_numbers<[1], [0], [0], [1], [0, 0, 1, 1], [], []>} : vector<15x8xbf16>, vector<8x32xbf16>, vector<15x32xf32> -> vector<15x32xf32>
    %325 = arith.addf %299, %324 : vector<15x32xf32>
    %326 = arith.addf %187, %325 : vector<15x32xf32>
    %c1_106 = arith.constant 1 : index
    %c0_107 = arith.constant 0 : index
    %c0_108 = arith.constant 0 : index
    %327 = vector.load %arg7[%c1_106, %c0_107, %c0_108] : memref<2x1x32xf32, #tpu.memory_space<vmem>>, vector<1x1x32xf32>
    %328 = vector.shape_cast %327 : vector<1x1x32xf32> to vector<1x32xf32>
    %329 = arith.mulf %326, %326 : vector<15x32xf32>
    %cst_109 = arith.constant dense<0.000000e+00> : vector<15xf32>
    %330 = vector.multi_reduction <add>, %329, %cst_109 [1] : vector<15x32xf32> to vector<15xf32>
    %331 = vector.shape_cast %330 : vector<15xf32> to vector<15x1xf32>
    %cst_110 = arith.constant 3.200000e+01 : f32
    %332 = vector.broadcast %cst_110 : f32 to vector<15x1xf32>
    %333 = arith.divf %331, %332 : vector<15x1xf32>
    %cst_111 = arith.constant 9.99999997E-7 : f32
    %334 = vector.broadcast %cst_111 : f32 to vector<15x1xf32>
    %335 = arith.addf %333, %334 : vector<15x1xf32>
    %336 = math.rsqrt %335 : vector<15x1xf32>
    %337 = vector.broadcast %336 : vector<15x1xf32> to vector<15x32xf32>
    %338 = arith.mulf %326, %337 : vector<15x32xf32>
    %339 = vector.broadcast %328 : vector<1x32xf32> to vector<15x32xf32>
    %340 = arith.mulf %338, %339 : vector<15x32xf32>
    %c1_112 = arith.constant 1 : index
    %c0_113 = arith.constant 0 : index
    %c0_114 = arith.constant 0 : index
    %341 = vector.load %arg10[%c1_112, %c0_113, %c0_114] : memref<2x32x128xbf16, #tpu.memory_space<vmem>>, vector<1x32x128xbf16>
    %342 = vector.shape_cast %341 : vector<1x32x128xbf16> to vector<32x128xbf16>
    %343 = arith.truncf %340 : vector<15x32xf32> to vector<15x32xbf16>
    %cst_115 = arith.constant dense<0.000000e+00> : vector<15x128xf32>
    %344 = tpu.matmul %343, %342, %cst_115 {dimension_numbers = #tpu.dot_dimension_numbers<[1], [0], [0], [1], [0, 0, 1, 1], [], []>} : vector<15x32xbf16>, vector<32x128xbf16>, vector<15x128xf32> -> vector<15x128xf32>
    %345 = vector.extract_strided_slice %344 {offsets = [0, 0], sizes = [15, 64], strides = [1, 1]} : vector<15x128xf32> to vector<15x64xf32>
    %346 = vector.extract_strided_slice %344 {offsets = [0, 64], sizes = [15, 64], strides = [1, 1]} : vector<15x128xf32> to vector<15x64xf32>
    %347 = arith.negf %345 : vector<15x64xf32>
    %348 = math.exp %347 : vector<15x64xf32>
    %cst_116 = arith.constant 1.000000e+00 : f32
    %349 = vector.broadcast %cst_116 : f32 to vector<15x64xf32>
    %350 = arith.addf %349, %348 : vector<15x64xf32>
    %351 = arith.divf %349, %350 : vector<15x64xf32>
    %352 = arith.mulf %345, %351 : vector<15x64xf32>
    %353 = arith.mulf %352, %346 : vector<15x64xf32>
    %c1_117 = arith.constant 1 : index
    %c0_118 = arith.constant 0 : index
    %c0_119 = arith.constant 0 : index
    %354 = vector.load %arg11[%c1_117, %c0_118, %c0_119] : memref<2x64x32xbf16, #tpu.memory_space<vmem>>, vector<1x64x32xbf16>
    %355 = vector.shape_cast %354 : vector<1x64x32xbf16> to vector<64x32xbf16>
    %356 = arith.truncf %353 : vector<15x64xf32> to vector<15x64xbf16>
    %cst_120 = arith.constant dense<0.000000e+00> : vector<15x32xf32>
    %357 = tpu.matmul %356, %355, %cst_120 {dimension_numbers = #tpu.dot_dimension_numbers<[1], [0], [0], [1], [0, 0, 1, 1], [], []>} : vector<15x64xbf16>, vector<64x32xbf16>, vector<15x32xf32> -> vector<15x32xf32>
    %358 = arith.addf %326, %357 : vector<15x32xf32>
    %c0_121 = arith.constant 0 : index
    %c0_122 = arith.constant 0 : index
    %359 = vector.load %arg12[%c0_121, %c0_122] : memref<1x32xf32, #tpu.memory_space<vmem>>, vector<1x32xf32>
    %360 = arith.mulf %358, %358 : vector<15x32xf32>
    %cst_123 = arith.constant dense<0.000000e+00> : vector<15xf32>
    %361 = vector.multi_reduction <add>, %360, %cst_123 [1] : vector<15x32xf32> to vector<15xf32>
    %362 = vector.shape_cast %361 : vector<15xf32> to vector<15x1xf32>
    %cst_124 = arith.constant 3.200000e+01 : f32
    %363 = vector.broadcast %cst_124 : f32 to vector<15x1xf32>
    %364 = arith.divf %362, %363 : vector<15x1xf32>
    %cst_125 = arith.constant 9.99999997E-7 : f32
    %365 = vector.broadcast %cst_125 : f32 to vector<15x1xf32>
    %366 = arith.addf %364, %365 : vector<15x1xf32>
    %367 = math.rsqrt %366 : vector<15x1xf32>
    %368 = vector.broadcast %367 : vector<15x1xf32> to vector<15x32xf32>
    %369 = arith.mulf %358, %368 : vector<15x32xf32>
    %370 = vector.broadcast %359 : vector<1x32xf32> to vector<15x32xf32>
    %371 = arith.mulf %369, %370 : vector<15x32xf32>
    %c0_126 = arith.constant 0 : index
    %c0_127 = arith.constant 0 : index
    %372 = vector.load %arg13[%c0_126, %c0_127] : memref<32x128xbf16, #tpu.memory_space<vmem>>, vector<32x128xbf16>
    %373 = arith.truncf %371 : vector<15x32xf32> to vector<15x32xbf16>
    %cst_128 = arith.constant dense<0.000000e+00> : vector<15x128xf32>
    %374 = tpu.matmul %373, %372, %cst_128 {dimension_numbers = #tpu.dot_dimension_numbers<[1], [0], [0], [1], [0, 0, 1, 1], [], []>} : vector<15x32xbf16>, vector<32x128xbf16>, vector<15x128xf32> -> vector<15x128xf32>
    %c0_129 = arith.constant 0 : index
    %c0_130 = arith.constant 0 : index
    %c0_131 = arith.constant 0 : index
    %375 = vector.load %arg14[%c0_129, %c0_130, %c0_131] : memref<1x15x128xf32, #tpu.memory_space<vmem>>, vector<1x15x128xf32>
    %376 = vector.shape_cast %375 : vector<1x15x128xf32> to vector<15x128xf32>
    %377 = vector.shape_cast %374 : vector<15x128xf32> to vector<1x15x128xf32>
    tpu.vector_store %arg14[%c0_129, %c0_130, %c0_131], %377 {strides = array<i32>} : memref<1x15x128xf32, #tpu.memory_space<vmem>>, vector<1x15x128xf32>,
    return
  }
  func.func @transform_0(%arg0: i32) -> (i32, i32, i32) {
    %c0_i32 = arith.constant 0 : i32
    %c0_i32_0 = arith.constant 0 : i32
    %c0_i32_1 = arith.constant 0 : i32
    return %arg0, %c0_i32, %c0_i32_0 : i32, i32, i32
  }
  func.func @transform_1(%arg0: i32) -> (i32, i32, i32) {
    %c0_i32 = arith.constant 0 : i32
    %c0_i32_0 = arith.constant 0 : i32
    %c0_i32_1 = arith.constant 0 : i32
    return %arg0, %c0_i32, %c0_i32_0 : i32, i32, i32
  }
  func.func @transform_2(%arg0: i32) -> (i32, i32) {
    %c0_i32 = arith.constant 0 : i32
    %c0_i32_0 = arith.constant 0 : i32
    %c0_i32_1 = arith.constant 0 : i32
    return %c0_i32, %c0_i32_0 : i32, i32
  }
  func.func @transform_3(%arg0: i32) -> (i32, i32) {
    %c0_i32 = arith.constant 0 : i32
    %c0_i32_0 = arith.constant 0 : i32
    %c0_i32_1 = arith.constant 0 : i32
    return %c0_i32, %c0_i32_0 : i32, i32
  }
  func.func @transform_4(%arg0: i32) -> (i32, i32) {
    %c0_i32 = arith.constant 0 : i32
    %c0_i32_0 = arith.constant 0 : i32
    %c0_i32_1 = arith.constant 0 : i32
    return %c0_i32, %c0_i32_0 : i32, i32
  }
  func.func @transform_5(%arg0: i32) -> (i32, i32, i32) {
    %c0_i32 = arith.constant 0 : i32
    %c0_i32_0 = arith.constant 0 : i32
    %c0_i32_1 = arith.constant 0 : i32
    %c0_i32_2 = arith.constant 0 : i32
    return %c0_i32, %c0_i32_0, %c0_i32_1 : i32, i32, i32
  }
  func.func @transform_6(%arg0: i32) -> (i32, i32, i32) {
    %c0_i32 = arith.constant 0 : i32
    %c0_i32_0 = arith.constant 0 : i32
    %c0_i32_1 = arith.constant 0 : i32
    %c0_i32_2 = arith.constant 0 : i32
    return %c0_i32, %c0_i32_0, %c0_i32_1 : i32, i32, i32
  }
  func.func @transform_7(%arg0: i32) -> (i32, i32, i32) {
    %c0_i32 = arith.constant 0 : i32
    %c0_i32_0 = arith.constant 0 : i32
    %c0_i32_1 = arith.constant 0 : i32
    %c0_i32_2 = arith.constant 0 : i32
    return %c0_i32, %c0_i32_0, %c0_i32_1 : i32, i32, i32
  }
  func.func @transform_8(%arg0: i32) -> (i32, i32, i32) {
    %c0_i32 = arith.constant 0 : i32
    %c0_i32_0 = arith.constant 0 : i32
    %c0_i32_1 = arith.constant 0 : i32
    %c0_i32_2 = arith.constant 0 : i32
    return %c0_i32, %c0_i32_0, %c0_i32_1 : i32, i32, i32
  }
  func.func @transform_9(%arg0: i32) -> (i32, i32, i32) {
    %c0_i32 = arith.constant 0 : i32
    %c0_i32_0 = arith.constant 0 : i32
    %c0_i32_1 = arith.constant 0 : i32
    %c0_i32_2 = arith.constant 0 : i32
    return %c0_i32, %c0_i32_0, %c0_i32_1 : i32, i32, i32
  }
  func.func @transform_10(%arg0: i32) -> (i32, i32, i32) {
    %c0_i32 = arith.constant 0 : i32
    %c0_i32_0 = arith.constant 0 : i32
    %c0_i32_1 = arith.constant 0 : i32
    %c0_i32_2 = arith.constant 0 : i32
    return %c0_i32, %c0_i32_0, %c0_i32_1 : i32, i32, i32
  }
  func.func @transform_11(%arg0: i32) -> (i32, i32) {
    %c0_i32 = arith.constant 0 : i32
    %c0_i32_0 = arith.constant 0 : i32
    %c0_i32_1 = arith.constant 0 : i32
    return %c0_i32, %c0_i32_0 : i32, i32
  }
  func.func @transform_12(%arg0: i32) -> (i32, i32) {
    %c0_i32 = arith.constant 0 : i32
    %c0_i32_0 = arith.constant 0 : i32
    %c0_i32_1 = arith.constant 0 : i32
    return %c0_i32, %c0_i32_0 : i32, i32
  }
  func.func @transform_13(%arg0: i32) -> (i32, i32, i32) {
    %c0_i32 = arith.constant 0 : i32
    %c0_i32_0 = arith.constant 0 : i32
    %c0_i32_1 = arith.constant 0 : i32
    return %arg0, %c0_i32, %c0_i32_0 : i32, i32, i32
  }
}

</mosaic_0001>

<bundles_post_ra>
// kernel: valle_ar_forward.1
= control target key start
LH: loop header
LB: loop body
LE: loop exit
PB: predicated region body
PF: predicated region fallthrough
CT: control target
= control target key end

     0   :  { %s3538_s25 = smov 0   ;;  %s4094_s0 = inlined_call_operand.vmem [shape: f32[2,15,32], index: 0, kind: input, shape index: {}]   ;;  %s4095_s1 = inlined_call_operand.vmem [shape: s32[2,1,15], index: 1, kind: input, shape index: {}]   ;;  %s4096_s2 = inlined_call_operand.vmem [shape: f32[15,32], index: 2, kind: input, shape index: {}]   ;;  %s4097_s3 = inlined_call_operand.vmem [shape: f32[15,32], index: 3, kind: input, shape index: {}]   ;;  %s4098_s4 = inlined_call_operand.vmem [shape: bf16[32,32], index: 4, kind: input, shape index: {}]   ;;  %s4099_s5 = inlined_call_operand.vmem [shape: f32[2,1,32], index: 5, kind: input, shape index: {}, may-alias: {5,6}]   ;;  %s4100_s6 = inlined_call_operand.vmem [shape: f32[2,1,32], index: 6, kind: input, shape index: {}, may-alias: {5,6}]   ;;  %s4101_s7 = inlined_call_operand.vmem [shape: bf16[2,32,96], index: 7, kind: input, shape index: {}]   ;;  %s4102_s8 = inlined_call_operand.vmem [shape: bf16[2,32,32], index: 8, kind: input, shape index: {}]   ;;  %s4103_s9 = inlined_call_operand.vmem [shape: bf16[2,32,128], index: 9, kind: input, shape index: {}]   ;;  %s4104_s10 = inlined_call_operand.vmem [shape: bf16[2,64,32], index: 10, kind: input, shape index: {}]   ;;  %s4105_s11 = inlined_call_operand.vmem [shape: f32[1,32], index: 11, kind: input, shape index: {}]   ;;  %s4106_s12 = inlined_call_operand.vmem [shape: bf16[32,128], index: 12, kind: input, shape index: {}]   ;;  %s4107_s13 = inlined_call_operand.vmem [shape: f32[2,15,128], index: 13, kind: output, shape index: {}]  }
   0x1 LB: > { %s2873_s26 = sadd.s32 4294967295, %s3449_s25   ;;  %p2877_p0 = scmp.ge.s32.totalorder %s3449_s25, 1  ;;  %s3449_s25 = sphi %s3538_s25, %s23_s25  }
   0x2   : > { %p395_p1 = scmp.lt.s32.totalorder %s3449_s25, 3 }
   0x4   : > { %p396_p2 = pnand %p2877_p0, %p395_p1 }
   0x5   : > { %p442_p3 = scmp.lt.s32.totalorder (!%p396_p2), %s2873_s26, 1  ;;  %vm488_vm0 = vcmask (!%p396_p2), 261120   ;;  %vm492_vm1 = vcmask (!%p396_p2), 260096   ;;  %v3322_v6 = vld [vmem:[%s4101_s7] sm:$0xff] (!%p396_p2)   ;;  %v3451_v7 = vmov (!%p396_p2), 0.0   ;;  %vm3452_vm2 = vmmov (!%p396_p2), 0  }
   0x6   : > { %399 = sbr.rel (%p396_p2) target bundleno = 8304 (0x2070), region = 72  ;;  %3057 = vmatprep.subr.bf16.mxu0 (!%p396_p2), %v3451_v7  ;;  %3061 = vmatprep.mubr.msk.bf16.mxu0 (!%p396_p2), %vm3452_vm2, %v3451_v7  ;;  %v3323_v8 = vld [vmem:[%s4101_s7 + $0x8] sm:$0xff] (!%p396_p2)   ;;  %v3584_v10 = vld [vmem:[%s4098_s4] sm:$0xff] (!%p396_p2)   ;;  %s3453_s22 = smov (!%p396_p2), 32   ;;  %vm715_vm3 = vcmask (!%p396_p2), 64512   ;;  %vm767_vm10 = vcmask (!%p396_p2), 121856  }
   0x7   : > { %3058 = vmatpush3.bf16.msra.mxu0 (!%p396_p2), %v3322_v6  ;;  %3065 = vmatprep.subr.bf16.mxu1 (!%p396_p2), %v3451_v7  ;;  %v459_v9 = vld [vmem:[%s4096_s2 + $0x8] sm:$0x7f] (!%p396_p2)  ;;  %v2882_v20 = vld [vmem:[%s4099_s5] ss:$0 sm:$0xff] (!%p396_p2)  ;;  %s3455_s20 = smov (!%p396_p2), 88   ;;  %s3456_s21 = smov (!%p396_p2), 120  }
   0x8   : > { %3059 = vmatprep.subr.bf16.mxu0 (!%p396_p2), %v3451_v7  ;;  %3069 = vmatprep.mubr.msk.bf16.mxu1 (!%p396_p2), %vm3452_vm2, %v3451_v7  ;;  %v3602_v25 = vld [vmem:[%s4098_s4 + $0x8] sm:$0xff] (!%p396_p2)   ;;  %v3619_v31 = vld [vmem:[%s4096_s2] sm:$0xff] (!%p396_p2)  ;;  %vm771_vm11 = vcmask (!%p396_p2), 120832   ;;  %s3459_s29 = smov (!%p396_p2), 56   ;;  %s3460_s14 = smov (!%p396_p2), 64   ;;  %vm797_vm12 = vcmask (!%p396_p2), 1046528  }
   0x9   : > { %3066 = vmatpush3.bf16.msra.mxu1 (!%p396_p2), %v3584_v10  ;;  %v3629_v33 = vld [vmem:[%s4097_s3] sm:$0xff] (!%p396_p2)  ;;  %v3634_v35 = vld [vmem:[%s4097_s3 + $0x8] sm:$0x7f] (!%p396_p2)  ;;  %s3461_s15 = smov (!%p396_p2), 80   ;;  %s3462_s16 = smov (!%p396_p2), 112   ;;  %vm798_vm13 = vcmask (!%p396_p2), 1047552  }
   0xa   : > { %3067 = vmatprep.subr.bf16.mxu1 (!%p396_p2), %v3451_v7  ;;  %vm978_vm14 = vcmask (!%p396_p2), 1043456   ;;  %s4112_s24 = smov (!%p396_p2), 72   ;;  %s4110_s17 = smov (!%p396_p2), 104   ;;  %vm1569_vm15 = vcmask (!%p396_p2), 523264  }
   0xb   : > { %3060 = vmatpush3.bf16.msra.mxu0 (!%p396_p2), %v3323_v8  ;;  %s4109_s23 = smov (!%p396_p2), 40   ;;  %s4116_s19 = smov (!%p396_p2), 40  }
   0xc   : > { %3073 = vmatprep.subr.bf16.mxu0 (!%p396_p2), %v3451_v7 }
   0xd   : > { %s4119_s26 = smov (!%p442_p3, %s2873_s26), 1  ;;  %3068 = vmatpush3.bf16.msra.mxu1 %v3602_v25 }
   0xe   : > { %s4108_s27 = sshll.u32 %s4119_s26, 4  ;;  %3081 = vmatprep.subr.bf16.mxu1 %v3451_v7  ;;  %s449_s28 = scalar_lea.vmem %s4095_s1, %s4119_s26 }
   0xf   : > { %s446_s30 = scalar_lea.vmem %s4094_s0, %s4108_s27 }
  0x10   : > { %v3554_v0 = vld [vmem:[%s446_s30] sm:$0xff]  ;;  %v3556_v1 = vld [vmem:[%s446_s30 + $0x8] sm:$0x7f]  ;;  %s3454_s30 = smov 96  }
  0x11   : > { %v486_v2 = vmul.f32 %v3554_v0, %v3554_v0  ;;  %v487_v3 = vmul.f32 %v3556_v1, %v3556_v1 }
  0x13   : > { %v489_v4 = vsel %vm488_vm0, %v486_v2, 0.0  ;;  %v493_v5 = vsel %vm492_vm1, %v487_v3, 0.0 }
  0x14   : > { %490 = vadd.xlane.f32.xlu0 %v489_v4  ;;  %v466_v4 = vlaneseq }
  0x16   : > { %v467_v6 = vshrl.u32 %v466_v4, 7 }
  0x18   : > { %494 = vadd.xlane.f32.xlu0 %v493_v5  ;;  %v471_v5 = vld [vmem:[%s449_s28] sm:$0x1]  ;;  %v478_v8 = vsub.s32 0, %v467_v6  ;;  %s4111_s28 = smov 48  }
  0x19   : > { %vm472_vm4 = vcmp.gt.s32.totalorder %v471_v5, 0 }
  0x2e   : > { %641 = vrot.lane.b32.xlu0 %v459_v9, %s3453_s22 }
  0xa1   : > { %v491_v11 = vpop.xlane.xlu0 %490 }
  0xa2   : > { %v497_v12 = vmul.f32 0.03125, %v491_v11 }
  0xa4   : > { %v499_v13 = vadd.f32 1e-06, %v497_v12  ;;  %v470_v12 = vand.u32 127, %v466_v4 }
  0xa5   : > { %v495_v14 = vpop.xlane.xlu0 %494 }
  0xa6   : > { %3342 = vrsqrt.f32 %v499_v13  ;;  %v498_v15 = vmul.f32 0.03125, %v495_v14  ;;  %v468_v14 = vadd.s32 8, %v467_v6  ;;  %vm473_vm5 = vcmp.le.s32.totalorder %v470_v12, %v467_v6 }
  0xa8   : > { %v500_v16 = vadd.f32 1e-06, %v498_v15  ;;  %vm474_vm7 = vcmp.le.s32.totalorder %v470_v12, %v468_v14  ;;  %v3458_v15 = vmov -1e+09  }
  0xa9   : > { %v3647_v53 = vpop.permute.xlu0 %641 }
  0xaa   : > { %3344 = vrsqrt.f32 %v500_v16 }
  0xb0   : > { %v3343_v17 = vpop.eup %3342 }
  0xb1   : > { %v503_v18 = vmul.f32 %v3343_v17, %v3554_v0 }
  0xb3   : > { %v511_v22 = vmul.f32 %v2882_v20, %v503_v18 }
  0xb4   : > { %v3345_v19 = vpop.eup %3344 }
  0xb5   : > { %v504_v21 = vmul.f32 %v3345_v19, %v3556_v1 }
  0xb7   : > { %v512_v23 = vmul.f32 %v2882_v20, %v504_v21 }
  0xb9   : > { %v517_v24 = vpack.c.bf16 %v512_v23, %v511_v22 }
  0xbb   : > { %3062 = vmatmul.mubr.msk.bf16.vlgmr.msra.gmra.mrb[0].mxu0 %vm488_vm0, %v517_v24 }
  0xbc   : > { %3074 = vmatpush3.bf16.msra.mxu0 %v3584_v10  ;;  %3077 = vmatprep.mubr.msk.bf16.mxu0 %vm3452_vm2, %v3451_v7 }
  0xbd   : > { %3075 = vmatprep.subr.bf16.mxu0 %v3451_v7 }
  0xc0   : > { %3076 = vmatpush3.bf16.msra.mxu0 %v3602_v25 }
  0xc1   : > { %3087 = vmatprep.subr.bf16.mxu0 %v3451_v7 }
 0x18e   : > { %v567_v26 = vpop.f32.mrb[0].mxu0 }
 0x18f   : > { %v3063_v27 = vpop.f32.mrb[1].mxu0  ;;  %v574_v36 = vmul.f32 %v567_v26, %v3619_v31 }
 0x190   : > { %v570_v28 = vpop.f32.mrb[2].mxu0 }
 0x191   : > { %v3608_v29 = vpack.c.bf16 %v570_v28, %v567_v26  ;;  %v3064_v30 = vpop.f32.mrb[3].mxu0  ;;  %v575_v40 = vmul.f32 %v570_v28, %v459_v9  ;;  %v646_v55 = vmul.f32 %v3647_v53, %v570_v28  ;;  %v3457_v9 = vmov 0  }
 0x192   : > { %v475_v11 = vsel %vm472_vm4, 1, %v3457_v9 }
 0x193   : > { %648 = vrot.lane.b32.xlu1 %v3608_v29, %s3454_s30  ;;  %3070 = vmatmul.mubr.msk.bf16.vlgmr.msra.gmra.mrb[0].mxu1 %vm488_vm0, %v3608_v29  ;;  %v479_v13 = vrot.slane %v475_v11, %v478_v8  ;;  %v3463_v8 = vmov 65535  }
 0x194   : > { %3083 = vmatprep.mubr.msk.bf16.mxu1 %vm3452_vm2, %v3451_v7  ;;  %v799_v9 = vsel %vm797_vm12, 4294967295, %v3463_v8 }
 0x195   : > { %vm480_vm6 = vcmp.eq.s32.totalorder %v479_v13, 1  ;;  %v3698_v13 = vsel %vm798_vm13, %v799_v9, 0 }
 0x196   : > { %vm481_vm8 = vmand %vm473_vm5, %vm480_vm6 }
 0x197   : > { %639 = vrot.lane.b32.xlu1 %v3619_v31, %s3453_s22  ;;  %vm482_vm9 = vmand %vm474_vm7, %vm480_vm6  ;;  %v3674_v16 = vsel %vm481_vm8, 0.0, %v3458_v15 }
 0x198   : > { %v3676_v20 = vsel %vm482_vm9, 0.0, %v3458_v15 }
 0x205   : > { %v649_v32 = vpop.permute.xlu1 %648 }
 0x206   : > { %3078 = vmatmul.mubr.msk.bf16.vlgmr.msra.gmra.mrb[4].mxu0 %vm488_vm0, %v649_v32 }
 0x207   : > { %3089 = vmatprep.mubr.msk.bf16.mxu0 %vm3452_vm2, %v3451_v7 }
 0x209   : > { %v3645_v52 = vpop.permute.xlu1 %639 }
 0x20a   : > { %v645_v56 = vmul.f32 %v3645_v52, %v567_v26 }
 0x266   : > { %v626_v34 = vpop.f32.mrb[0].mxu1 }
 0x267   : > { %v633_v37 = vmul.f32 %v626_v34, %v3629_v33  ;;  %v3071_v38 = vpop.f32.mrb[1].mxu1 }
 0x268   : > { %v629_v39 = vpop.f32.mrb[2].mxu1 }
 0x269   : > { %v635_v41 = vadd.f32 %v633_v37, %v574_v36  ;;  %v634_v42 = vmul.f32 %v629_v39, %v3634_v35  ;;  %v3072_v43 = vpop.f32.mrb[3].mxu1 }
 0x26b   : > { %v636_v44 = vadd.f32 %v634_v42, %v575_v40 }
 0x26d   : > { %v3639_v45 = vpack.c.bf16 %v636_v44, %v635_v41 }
 0x2d9   : > { %v687_v46 = vpop.f32.mrb[4].mxu0 }
 0x2da   : > { %v694_v47 = vmul.f32 %v687_v46, %v3629_v33  ;;  %v3079_v48 = vpop.f32.mrb[5].mxu0 }
 0x2db   : > { %v690_v49 = vpop.f32.mrb[6].mxu0 }
 0x2dc   : > { %698 = vrot.lane.b32.xlu1 %v694_v47, %s3453_s22  ;;  %v3080_v50 = vpop.f32.mrb[7].mxu0  ;;  %v695_v51 = vmul.f32 %v690_v49, %v3634_v35 }
 0x2e0   : > { %700 = vrot.lane.b32.xlu1 %v695_v51, %s3453_s22 }
 0x34e   : > { %v699_v54 = vpop.permute.xlu1 %698 }
 0x34f   : > { %v704_v58 = vadd.f32 %v699_v54, %v645_v56 }
 0x352   : > { %v701_v57 = vpop.permute.xlu1 %700 }
 0x353   : > { %v705_v59 = vadd.f32 %v701_v57, %v646_v55 }
 0x355   : > { %v3651_v60 = vpack.c.bf16 %v705_v59, %v704_v58 }
 0x357   : > { %713 = vrot.lane.b32.xlu1 %v3651_v60, %s3454_s30 }
 0x35b   : > { %849 = vrot.lane.b32.xlu1 %v3651_v60, %s3455_s20 }
 0x35f   : > { %847 = vrot.lane.b32.xlu1 %v3639_v45, %s3456_s21 }
 0x3c9   : > { %v714_v61 = vpop.permute.xlu1 %713 }
 0x3ca   : > { %v720_v62 = vsel %vm715_vm3, %v714_v61, 0 }
 0x3cb   : > { %3082 = vmatpush3.bf16.xpose.msra.mxu1 %v720_v62 }
 0x3cc   : > { %3093 = vmatprep.subr.bf16.mxu1 %v3451_v7 }
 0x3cd   : > { %v850_v63 = vpop.permute.xlu1 %849 }
 0x3ce   : > { %v855_v2 = vsel %vm715_vm3, %v850_v63, 0 }
 0x3d1   : > { %v848_v3 = vpop.permute.xlu1 %847 }
 0x3d2   : > { %3084 = vmatmul.mubr.msk.bf16.vlgmr.msra.gmra.mrb[4].mxu1 %vm715_vm3, %v3639_v45 }
 0x3d3   : > { %3094 = vmatpush3.bf16.xpose.msra.mxu1 %v855_v2  ;;  %3095 = vmatprep.mubr.msk.bf16.mxu1 %vm3452_vm2, %v3451_v7 }
 0x3d4   : > { %3105 = vmatprep.subr.bf16.mxu1 %v3451_v7 }
 0x3da   : > { %3096 = vmatmul.mubr.msk.bf16.vlgmr.msra.gmra.mrb[8].mxu1 %vm715_vm3, %v848_v3 }
 0x3db   : > { %3107 = vmatprep.mubr.msk.bf16.mxu1 %vm3452_vm2, %v3451_v7 }
 0x4a5   : > { %v756_v17 = vpop.f32.mrb[4].mxu1 }
 0x4a6   : > { %v763_v18 = vmul.f32 0.35355338, %v756_v17  ;;  %v3085_v19 = vpop.f32.mrb[5].mxu1 }
 0x4a7   : > { %v759_v21 = vpop.f32.mrb[6].mxu1 }
 0x4a8   : > { %v764_v22 = vmul.f32 0.35355338, %v759_v21  ;;  %v3086_v23 = vpop.f32.mrb[7].mxu1  ;;  %v765_v24 = vadd.f32 %v763_v18, %v3674_v16 }
 0x4aa   : > { %v768_v26 = vsel %vm767_vm10, %v765_v24, -inf  ;;  %v766_v27 = vadd.f32 %v764_v22, %v3676_v20 }
 0x4ab   : > { %769 = vmax.xlane.f32.xlu1 %v768_v26 }
 0x4ac   : > { %v772_v28 = vsel %vm771_vm11, %v766_v27, -inf }
 0x4ad   : > { %773 = vmax.xlane.f32.xlu0 %v772_v28  ;;  %v891_v30 = vpop.f32.mrb[8].mxu1 }
 0x4ae   : > { %v898_v32 = vmul.f32 0.35355338, %v891_v30  ;;  %v3097_v34 = vpop.f32.mrb[9].mxu1 }
 0x4af   : > { %v894_v36 = vpop.f32.mrb[10].mxu1  ;;  %v706_v34 = vld [vmem:[%s4102_s8] sm:$0xf] }
 0x4b0   : > { %v899_v37 = vmul.f32 0.35355338, %v894_v36  ;;  %v3098_v38 = vpop.f32.mrb[11].mxu1  ;;  %v900_v39 = vadd.f32 %v898_v32, %v3674_v16  ;;  %v1027_v36 = vsel %vm978_vm14, %v706_v34, 0 }
 0x4b2   : > { %v902_v40 = vsel %vm767_vm10, %v900_v39, -inf  ;;  %v901_v41 = vadd.f32 %v899_v37, %v3676_v20  ;;  %v707_v37 = vld [vmem:[%s4102_s8 + $0x4] sm:$0xf] }
 0x4b3   : > { %903 = vmax.xlane.f32.xlu0 %v902_v40  ;;  %v980_v38 = vsel %vm978_vm14, %v707_v37, 0 }
 0x4b4   : > { %v905_v42 = vsel %vm771_vm11, %v901_v41, -inf  ;;  %3106 = vmatpush3.bf16.msra.mxu1 %v980_v38 }
 0x4b5   : > { %906 = vmax.xlane.f32.xlu1 %v905_v42  ;;  %3117 = vmatprep.subr.bf16.mxu1 %v3451_v7 }
 0x538   : > { %v770_v43 = vpop.xlane.xlu1 %769 }
 0x539   : > { %v775_v44 = vsub.f32 %v765_v24, %v770_v43 }
 0x53a   : > { %v774_v46 = vpop.xlane.xlu0 %773 }
 0x53b   : > { %v777_v47 = vmul.f32 1.442695, %v775_v44  ;;  %v776_v48 = vsub.f32 %v766_v27, %v774_v46 }
 0x53d   : > { %3346 = vpow2.f32 %v777_v47  ;;  %v779_v49 = vmul.f32 1.442695, %v776_v48 }
 0x53f   : > { %3348 = vpow2.f32 %v779_v49 }
 0x540   : > { %v904_v50 = vpop.xlane.xlu0 %903 }
 0x541   : > { %v908_v51 = vsub.f32 %v900_v39, %v904_v50 }
 0x542   : > { %v907_v54 = vpop.xlane.xlu1 %906 }
 0x543   : > { %v910_v55 = vmul.f32 1.442695, %v908_v51  ;;  %v909_v56 = vsub.f32 %v901_v41, %v907_v54 }
 0x545   : > { %3350 = vpow2.f32 %v910_v55  ;;  %v912_v57 = vmul.f32 1.442695, %v909_v56 }
 0x547   : > { %v3347_v58 = vpop.eup %3346  ;;  %3352 = vpow2.f32 %v912_v57 }
 0x548   : > { %v781_v59 = vsel %vm767_vm10, %v3347_v58, 0.0 }
 0x549   : > { %v3349_v61 = vpop.eup %3348  ;;  %782 = vadd.xlane.f32.xlu0 %v781_v59 }
 0x54a   : > { %v784_v62 = vsel %vm771_vm11, %v3349_v61, 0.0 }
 0x54b   : > { %785 = vadd.xlane.f32.xlu1 %v784_v62 }
 0x54f   : > { %v3351_v63 = vpop.eup %3350 }
 0x550   : > { %v914_v2 = vsel %vm767_vm10, %v3351_v63, 0.0 }
 0x551   : > { %v3353_v3 = vpop.eup %3352  ;;  %915 = vadd.xlane.f32.xlu0 %v914_v2 }
 0x552   : > { %v917_v4 = vsel %vm771_vm11, %v3353_v3, 0.0 }
 0x553   : > { %918 = vadd.xlane.f32.xlu1 %v917_v4 }
 0x564   : > { %925 = vrot.lane.b32.xlu1 %v3608_v29, %s3459_s29 }
 0x567   : > { %792 = vrot.lane.b32.xlu0 %v3608_v29, %s3460_s14 }
 0x568   : > { %1072 = vrot.lane.b32.xlu1 %v3651_v60, %s3461_s15 }
 0x56b   : > { %1070 = vrot.lane.b32.xlu0 %v3639_v45, %s3462_s16 }
 0x5d6   : > { %v783_v5 = vpop.xlane.xlu0 %782 }
 0x5d7   : > { %3354 = vrcp.f32 %v783_v5 }
 0x5d8   : > { %v786_v6 = vpop.xlane.xlu1 %785 }
 0x5d9   : > { %3356 = vrcp.f32 %v786_v6 }
 0x5de   : > { %v916_v11 = vpop.xlane.xlu0 %915 }
 0x5df   : > { %3358 = vrcp.f32 %v916_v11 }
 0x5e0   : > { %v919_v12 = vpop.xlane.xlu1 %918 }
 0x5e1   : > { %v3355_v14 = vpop.eup %3354  ;;  %3360 = vrcp.f32 %v919_v12 }
 0x5e2   : > { %v793_v15 = vpop.permute.xlu0 %792  ;;  %v789_v19 = vmul.f32 %v3355_v14, %v3347_v58 }
 0x5e3   : > { %v3357_v17 = vpop.eup %3356  ;;  %v802_v18 = vand.u32 %v3698_v13, %v793_v15 }
 0x5e4   : > { %v790_v21 = vmul.f32 %v3357_v17, %v3349_v61  ;;  %v926_v22 = vpop.permute.xlu1 %925 }
 0x5e5   : > { %3088 = vmatpush3.bf16.msra.mxu0 %v802_v18  ;;  %v931_v24 = vand.u32 %v926_v22, %v3698_v13 }
 0x5e6   : > { %v791_v23 = vpack.c.bf16 %v790_v21, %v789_v19  ;;  %3099 = vmatprep.subr.bf16.mxu0 %v3451_v7  ;;  %v1071_v54 = vpop.permute.xlu0 %1070 }
 0x5e8   : > { %3090 = vmatmul.mubr.msk.bf16.vlgmr.msra.gmra.mrb[8].mxu0 %vm767_vm10, %v791_v23  ;;  %v1073_v47 = vpop.permute.xlu1 %1072 }
 0x5e9   : > { %v3359_v26 = vpop.eup %3358  ;;  %3100 = vmatpush3.bf16.msra.mxu0 %v931_v24  ;;  %3101 = vmatprep.mubr.msk.bf16.mxu0 %vm3452_vm2, %v3451_v7  ;;  %v1078_v51 = vsel %vm715_vm3, %v1073_v47, 0 }
 0x5ea   : > { %3111 = vmatprep.subr.bf16.mxu0 %v3451_v7  ;;  %v922_v28 = vmul.f32 %v3359_v26, %v3351_v63 }
 0x5eb   : > { %v3361_v27 = vpop.eup %3360 }
 0x5ec   : > { %v923_v30 = vmul.f32 %v3361_v27, %v3353_v3 }
 0x5ee   : > { %v924_v32 = vpack.c.bf16 %v923_v30, %v922_v28 }
 0x5f0   : > { %3102 = vmatmul.mubr.msk.bf16.vlgmr.msra.gmra.mrb[12].mxu0 %vm767_vm10, %v924_v32 }
 0x5f1   : > { %3113 = vmatprep.mubr.msk.bf16.mxu0 %vm3452_vm2, %v3451_v7  ;;  %3112 = vmatpush3.bf16.msra.mxu0 %v1027_v36 }
 0x5f2   : > { %3123 = vmatprep.subr.bf16.mxu0 %v3451_v7 }
 0x6bb   : > { %v838_v39 = vpop.f32.mrb[8].mxu0 }
 0x6bc   : > { %v3091_v40 = vpop.f32.mrb[9].mxu0 }
 0x6bd   : > { %v841_v41 = vpop.f32.mrb[10].mxu0 }
 0x6be   : > { %v845_v42 = vpack.c.bf16 %v841_v41, %v838_v39  ;;  %v3092_v43 = vpop.f32.mrb[11].mxu0 }
 0x6c0   : > { %3114 = vmatmul.mubr.msk.bf16.vlgmr.msra.gmra.mrb[16].mxu0 %vm715_vm3, %v845_v42 }
 0x6c1   : > { %3125 = vmatprep.mubr.msk.bf16.mxu0 %vm3452_vm2, %v3451_v7 }
 0x6c3   : > { %v967_v44 = vpop.f32.mrb[12].mxu0 }
 0x6c4   : > { %v3103_v46 = vpop.f32.mrb[13].mxu0 }
 0x6c5   : > { %v970_v48 = vpop.f32.mrb[14].mxu0 }
 0x6c6   : > { %v974_v49 = vpack.c.bf16 %v970_v48, %v967_v44  ;;  %v3104_v50 = vpop.f32.mrb[15].mxu0  ;;  %v708_v44 = vld [vmem:[%s4102_s8 + $0x8] sm:$0xf] }
 0x6c7   : > { %v1202_v46 = vsel %vm978_vm14, %v708_v44, 0 }
 0x6c8   : > { %3108 = vmatmul.mubr.msk.bf16.vlgmr.msra.gmra.mrb[12].mxu1 %vm715_vm3, %v974_v49 }
 0x6c9   : > { %3118 = vmatpush3.bf16.xpose.msra.mxu1 %v1078_v51  ;;  %3119 = vmatprep.mubr.msk.bf16.mxu1 %vm3452_vm2, %v3451_v7 }
 0x6ca   : > { %3129 = vmatprep.subr.bf16.mxu1 %v3451_v7 }
 0x6d0   : > { %3120 = vmatmul.mubr.msk.bf16.vlgmr.msra.gmra.mrb[16].mxu1 %vm715_vm3, %v1071_v54 }
 0x6d1   : > { %3131 = vmatprep.mubr.msk.bf16.mxu1 %vm3452_vm2, %v3451_v7  ;;  %3130 = vmatpush3.bf16.msra.mxu1 %v1202_v46 }
 0x6d2   : > { %3141 = vmatprep.subr.bf16.mxu1 %v3451_v7 }
 0x793   : > { %v1063_v55 = vpop.f32.mrb[16].mxu0 }
 0x794   : > { %v3115_v56 = vpop.f32.mrb[17].mxu0 }
 0x795   : > { %v1066_v57 = vpop.f32.mrb[18].mxu0 }
 0x796   : > { %v3116_v58 = vpop.f32.mrb[19].mxu0 }
 0x79b   : > { %v1016_v59 = vpop.f32.mrb[12].mxu1 }
 0x79c   : > { %v3731_v61 = vadd.f32 %v1063_v55, %v1016_v59  ;;  %v3109_v62 = vpop.f32.mrb[13].mxu1 }
 0x79d   : > { %v1019_v63 = vpop.f32.mrb[14].mxu1 }
 0x79e   : > { %v3733_v2 = vadd.f32 %v1066_v57, %v1019_v63  ;;  %v3110_v3 = vpop.f32.mrb[15].mxu1 }
 0x7a3   : > { %v1114_v4 = vpop.f32.mrb[16].mxu1 }
 0x7a4   : > { %v1121_v5 = vmul.f32 0.35355338, %v1114_v4  ;;  %v3121_v6 = vpop.f32.mrb[17].mxu1 }
 0x7a5   : > { %v1117_v8 = vpop.f32.mrb[18].mxu1 }
 0x7a6   : > { %v1122_v9 = vmul.f32 0.35355338, %v1117_v8  ;;  %v3122_v11 = vpop.f32.mrb[19].mxu1  ;;  %v1123_v12 = vadd.f32 %v1121_v5, %v3674_v16 }
 0x7a8   : > { %v1125_v14 = vsel %vm767_vm10, %v1123_v12, -inf  ;;  %v1124_v15 = vadd.f32 %v1122_v9, %v3676_v20 }
 0x7a9   : > { %1126 = vmax.xlane.f32.xlu1 %v1125_v14 }
 0x7aa   : > { %v1128_v17 = vsel %vm771_vm11, %v1124_v15, -inf }
 0x7ab   : > { %1129 = vmax.xlane.f32.xlu0 %v1128_v17 }
 0x836   : > { %v1127_v18 = vpop.xlane.xlu1 %1126 }
 0x837   : > { %v1131_v19 = vsub.f32 %v1123_v12, %v1127_v18 }
 0x838   : > { %v1130_v21 = vpop.xlane.xlu0 %1129 }
 0x839   : > { %v1133_v22 = vmul.f32 1.442695, %v1131_v19  ;;  %v1132_v23 = vsub.f32 %v1124_v15, %v1130_v21 }
 0x83b   : > { %3362 = vpow2.f32 %v1133_v22  ;;  %v1135_v24 = vmul.f32 1.442695, %v1132_v23 }
 0x83d   : > { %3364 = vpow2.f32 %v1135_v24 }
 0x845   : > { %v3363_v26 = vpop.eup %3362 }
 0x846   : > { %v1137_v27 = vsel %vm767_vm10, %v3363_v26, 0.0 }
 0x847   : > { %v3365_v28 = vpop.eup %3364  ;;  %1138 = vadd.xlane.f32.xlu0 %v1137_v27 }
 0x848   : > { %v1140_v30 = vsel %vm771_vm11, %v3365_v28, 0.0 }
 0x849   : > { %1141 = vadd.xlane.f32.xlu1 %v1140_v30 }
 0x85a   : > { %1249 = vrot.lane.b32.xlu1 %v3651_v60, %s4112_s24 }
 0x85d   : > { %1148 = vrot.lane.b32.xlu0 %v3608_v29, %s4111_s28 }
 0x85e   : > { %1247 = vrot.lane.b32.xlu1 %v3639_v45, %s4110_s17 }
 0x8d4   : > { %v1139_v32 = vpop.xlane.xlu0 %1138 }
 0x8d5   : > { %3366 = vrcp.f32 %v1139_v32 }
 0x8d6   : > { %v1142_v34 = vpop.xlane.xlu1 %1141 }
 0x8d7   : > { %3368 = vrcp.f32 %v1142_v34 }
 0x8d8   : > { %v1149_v36 = vpop.permute.xlu0 %1148 }
 0x8d9   : > { %v1154_v37 = vand.u32 %v1149_v36, %v3698_v13 }
 0x8da   : > { %v1250_v41 = vpop.permute.xlu1 %1249 }
 0x8db   : > { %3124 = vmatpush3.bf16.msra.mxu0 %v1154_v37  ;;  %v1255_v43 = vsel %vm715_vm3, %v1250_v41, 0 }
 0x8dc   : > { %3135 = vmatprep.subr.bf16.mxu0 %v3451_v7 }
 0x8de   : > { %v1248_v45 = vpop.permute.xlu1 %1247 }
 0x8df   : > { %v3367_v38 = vpop.eup %3366 }
 0x8e0   : > { %v1145_v39 = vmul.f32 %v3367_v38, %v3363_v26 }
 0x8e1   : > { %v3369_v60 = vpop.eup %3368 }
 0x8e2   : > { %v1146_v40 = vmul.f32 %v3369_v60, %v3365_v28 }
 0x8e4   : > { %v1147_v42 = vpack.c.bf16 %v1146_v40, %v1145_v39 }
 0x8e6   : > { %3126 = vmatmul.mubr.msk.bf16.vlgmr.msra.gmra.mrb[20].mxu0 %vm767_vm10, %v1147_v42 }
 0x8e7   : > { %3136 = vmatpush3.bf16.xpose.msra.mxu0 %v1255_v43  ;;  %3137 = vmatprep.mubr.msk.bf16.mxu0 %vm3452_vm2, %v3451_v7 }
 0x8e8   : > { %3147 = vmatprep.subr.bf16.mxu0 %v3451_v7 }
 0x8ee   : > { %3138 = vmatmul.mubr.msk.bf16.vlgmr.msra.gmra.mrb[24].mxu0 %vm715_vm3, %v1248_v45 }
 0x8ef   : > { %3149 = vmatprep.mubr.msk.bf16.mxu0 %vm3452_vm2, %v3451_v7 }
 0x9b9   : > { %v1190_v47 = vpop.f32.mrb[20].mxu0 }
 0x9ba   : > { %v3127_v48 = vpop.f32.mrb[21].mxu0 }
 0x9bb   : > { %v1193_v49 = vpop.f32.mrb[22].mxu0 }
 0x9bc   : > { %v1197_v50 = vpack.c.bf16 %v1193_v49, %v1190_v47  ;;  %v3128_v51 = vpop.f32.mrb[23].mxu0 }
 0x9be   : > { %3132 = vmatmul.mubr.msk.bf16.vlgmr.msra.gmra.mrb[20].mxu1 %vm715_vm3, %v1197_v50 }
 0x9bf   : > { %3143 = vmatprep.mubr.msk.bf16.mxu1 %vm3452_vm2, %v3451_v7 }
 0x9c1   : > { %v1291_v54 = vpop.f32.mrb[24].mxu0 }
 0x9c2   : > { %v1298_v55 = vmul.f32 0.35355338, %v1291_v54  ;;  %v3139_v56 = vpop.f32.mrb[25].mxu0 }
 0x9c3   : > { %v1294_v57 = vpop.f32.mrb[26].mxu0 }
 0x9c4   : > { %v1299_v58 = vmul.f32 0.35355338, %v1294_v57  ;;  %v3140_v59 = vpop.f32.mrb[27].mxu0  ;;  %v1300_v62 = vadd.f32 %v1298_v55, %v3674_v16 }
 0x9c6   : > { %v1302_v63 = vsel %vm767_vm10, %v1300_v62, -inf  ;;  %v1301_v3 = vadd.f32 %v1299_v58, %v3676_v20 }
 0x9c7   : > { %1303 = vmax.xlane.f32.xlu0 %v1302_v63 }
 0x9c8   : > { %v1305_v4 = vsel %vm771_vm11, %v1301_v3, -inf }
 0x9c9   : > { %1306 = vmax.xlane.f32.xlu1 %v1305_v4 }
 0x9da   : > { %1325 = vrot.lane.b32.xlu1 %v3608_v29, %s4109_s23 }
 0xa54   : > { %v1304_v5 = vpop.xlane.xlu0 %1303 }
 0xa55   : > { %v1308_v6 = vsub.f32 %v1300_v62, %v1304_v5 }
 0xa56   : > { %v1307_v8 = vpop.xlane.xlu1 %1306 }
 0xa57   : > { %v1310_v9 = vmul.f32 1.442695, %v1308_v6  ;;  %v1309_v11 = vsub.f32 %v1301_v3, %v1307_v8  ;;  %v2902_v8 = vld [vmem:[%s4100_s6] ss:$0 sm:$0xff] }
 0xa59   : > { %3370 = vpow2.f32 %v1310_v9  ;;  %v1312_v12 = vmul.f32 1.442695, %v1309_v11 }
 0xa5a   : > { %v1326_v14 = vpop.permute.xlu1 %1325 }
 0xa5b   : > { %3372 = vpow2.f32 %v1312_v12  ;;  %v1331_v15 = vand.u32 %v1326_v14, %v3698_v13 }
 0xa5d   : > { %3142 = vmatpush3.bf16.msra.mxu1 %v1331_v15  ;;  %v3328_v15 = vld [vmem:[%s4104_s10] sm:$0xff]  }
 0xa5e   : > { %3153 = vmatprep.subr.bf16.mxu1 %v3451_v7 }
 0xa63   : > { %v3371_v17 = vpop.eup %3370 }
 0xa64   : > { %v1314_v18 = vsel %vm767_vm10, %v3371_v17, 0.0 }
 0xa65   : > { %v3373_v19 = vpop.eup %3372  ;;  %1315 = vadd.xlane.f32.xlu0 %v1314_v18  ;;  %v3330_v18 = vld [vmem:[%s4104_s10 + $0x10] sm:$0xff]  }
 0xa66   : > { %v1317_v29 = vsel %vm771_vm11, %v3373_v19, 0.0 }
 0xa69   : > { %1318 = vadd.xlane.f32.xlu0 %v1317_v29 }
 0xa91   : > { %v1238_v21 = vpop.f32.mrb[20].mxu1 }
 0xa92   : > { %v1245_v22 = vadd.f32 %v1238_v21, %v3731_v61  ;;  %v3133_v23 = vpop.f32.mrb[21].mxu1  ;;  %v709_v61 = vld [vmem:[%s4102_s8 + $0xc] sm:$0xf] }
 0xa93   : > { %v1241_v24 = vpop.f32.mrb[22].mxu1 }
 0xa94   : > { %v1246_v26 = vadd.f32 %v1241_v24, %v3733_v2  ;;  %v3134_v27 = vpop.f32.mrb[23].mxu1  ;;  %v1379_v2 = vsel %vm978_vm14, %v709_v61, 0 }
 0xa95   : > { %3148 = vmatpush3.bf16.msra.mxu0 %v1379_v2 }
 0xa96   : > { %3161 = vmatprep.subr.bf16.mxu0 %v3451_v7 }
 0xaf2   : > { %v1316_v28 = vpop.xlane.xlu0 %1315 }
 0xaf3   : > { %3374 = vrcp.f32 %v1316_v28 }
 0xaf6   : > { %v1319_v30 = vpop.xlane.xlu0 %1318 }
 0xaf7   : > { %3376 = vrcp.f32 %v1319_v30 }
 0xafd   : > { %v3375_v32 = vpop.eup %3374 }
 0xafe   : > { %v1322_v36 = vmul.f32 %v3375_v32, %v3371_v17  ;;  %v3329_v17 = vld [vmem:[%s4104_s10 + $0x8] sm:$0xff]  }
 0xb01   : > { %v3377_v34 = vpop.eup %3376 }
 0xb02   : > { %v1323_v37 = vmul.f32 %v3377_v34, %v3373_v19  ;;  %v3331_v19 = vld [vmem:[%s4104_s10 + $0x18] sm:$0xff]  }
 0xb04   : > { %v1324_v38 = vpack.c.bf16 %v1323_v37, %v1322_v36 }
 0xb06   : > { %3144 = vmatmul.mubr.msk.bf16.vlgmr.msra.gmra.mrb[24].mxu1 %vm767_vm10, %v1324_v38 }
 0xb07   : > { %3157 = vmatprep.mubr.msk.bf16.mxu1 %vm3452_vm2, %v3451_v7 }
 0xbd9   : > { %v1367_v60 = vpop.f32.mrb[24].mxu1 }
 0xbda   : > { %v3145_v39 = vpop.f32.mrb[25].mxu1 }
 0xbdb   : > { %v1370_v40 = vpop.f32.mrb[26].mxu1 }
 0xbdc   : > { %v1374_v41 = vpack.c.bf16 %v1370_v40, %v1367_v60  ;;  %v3146_v42 = vpop.f32.mrb[27].mxu1 }
 0xbde   : > { %3150 = vmatmul.mubr.msk.bf16.vlgmr.msra.gmra.mrb[28].mxu0 %vm715_vm3, %v1374_v41 }
 0xbdf   : > { %3169 = vmatprep.mubr.msk.bf16.mxu0 %vm3452_vm2, %v3451_v7  ;;  %3162 = vmatpush3.bf16.msra.mxu0 %v3328_v15 }
 0xbe0   : > { %3163 = vmatprep.subr.bf16.mxu0 %v3451_v7 }
 0xbe3   : > { %3164 = vmatpush3.bf16.msra.mxu0 %v3329_v17 }
 0xbe4   : > { %3165 = vmatprep.subr.bf16.mxu0 %v3451_v7 }
 0xbe7   : > { %3166 = vmatpush3.bf16.msra.mxu0 %v3330_v18 }
 0xbe8   : > { %3167 = vmatprep.subr.bf16.mxu0 %v3451_v7 }
 0xbeb   : > { %3168 = vmatpush3.bf16.msra.mxu0 %v3331_v19 }
 0xbec   : > { %3189 = vmatprep.subr.bf16.mxu0 %v3451_v7 }
 0xcb1   : > { %v1415_v43 = vpop.f32.mrb[28].mxu0 }
 0xcb2   : > { %v1422_v45 = vadd.f32 %v1415_v43, %v1245_v22  ;;  %v3151_v44 = vpop.f32.mrb[29].mxu0 }
 0xcb3   : > { %v1418_v46 = vpop.f32.mrb[30].mxu0 }
 0xcb4   : > { %v3789_v47 = vadd.f32 %v1422_v45, %v3554_v0  ;;  %v1423_v48 = vadd.f32 %v1418_v46, %v1246_v26  ;;  %v3152_v49 = vpop.f32.mrb[31].mxu0  ;;  %v3326_v0 = vld [vmem:[%s4103_s9] sm:$0xff]  }
 0xcb5   : > { %3154 = vmatpush3.bf16.msra.mxu1 %v3326_v0 }
 0xcb6   : > { %v3792_v50 = vadd.f32 %v1423_v48, %v3556_v1  ;;  %v1427_v51 = vmul.f32 %v3789_v47, %v3789_v47  ;;  %v3327_v1 = vld [vmem:[%s4103_s9 + $0x8] sm:$0xff]   ;;  %3155 = vmatprep.subr.bf16.mxu1 %v3451_v7 }
 0xcb8   : > { %v1429_v54 = vsel %vm488_vm0, %v1427_v51, 0.0  ;;  %v1428_v55 = vmul.f32 %v3792_v50, %v3792_v50 }
 0xcb9   : > { %1430 = vadd.xlane.f32.xlu0 %v1429_v54  ;;  %3156 = vmatpush3.bf16.msra.mxu1 %v3327_v1 }
 0xcba   : > { %v1432_v56 = vsel %vm492_vm1, %v1428_v55, 0.0  ;;  %3173 = vmatprep.subr.bf16.mxu1 %v3451_v7 }
 0xcbd   : > { %1433 = vadd.xlane.f32.xlu0 %v1432_v56 }
 0xd46   : > { %v1431_v57 = vpop.xlane.xlu0 %1430 }
 0xd47   : > { %v1435_v58 = vmul.f32 0.03125, %v1431_v57 }
 0xd49   : > { %v1437_v59 = vadd.f32 1e-06, %v1435_v58 }
 0xd4a   : > { %v1434_v62 = vpop.xlane.xlu0 %1433 }
 0xd4b   : > { %3378 = vrsqrt.f32 %v1437_v59  ;;  %v1436_v63 = vmul.f32 0.03125, %v1434_v62 }
 0xd4d   : > { %v1438_v3 = vadd.f32 1e-06, %v1436_v63 }
 0xd4f   : > { %3380 = vrsqrt.f32 %v1438_v3  ;;  %v2914_v3 = vld [vmem:[%s4099_s5 + $0x1] ss:$0 sm:$0xff] }
 0xd55   : > { %v3379_v4 = vpop.eup %3378 }
 0xd56   : > { %v1441_v5 = vmul.f32 %v3379_v4, %v3789_v47 }
 0xd58   : > { %v1449_v11 = vmul.f32 %v2902_v8, %v1441_v5 }
 0xd59   : > { %v3381_v6 = vpop.eup %3380 }
 0xd5a   : > { %v1442_v9 = vmul.f32 %v3381_v6, %v3792_v50 }
 0xd5c   : > { %v1450_v12 = vmul.f32 %v2902_v8, %v1442_v9 }
 0xd5e   : > { %v1455_v14 = vpack.c.bf16 %v1450_v12, %v1449_v11 }
 0xd60   : > { %3158 = vmatmul.mubr.msk.bf16.vlgmr.msra.gmra.mrb[28].mxu1 %vm488_vm0, %v1455_v14 }
 0xd61   : > { %3177 = vmatprep.mubr.msk.bf16.mxu1 %vm3452_vm2, %v3451_v7 }
 0xe33   : > { %v1505_v29 = vpop.f32.mrb[28].mxu1 }
 0xe34   : > { %1528 = vrot.lane.b32.xlu0 %v1505_v29, %s3460_s14  ;;  %v3159_v21 = vpop.f32.mrb[29].mxu1  ;;  %v2906_v24 = vmul.f32 -1.442695, %v1505_v29 }
 0xe35   : > { %v1508_v22 = vpop.f32.mrb[30].mxu1  ;;  %v3442_v21 = vld [vmem:[%s4096_s2 + $0x8] sm:$0x7f] }
 0xe36   : > { %1530 = vrot.lane.b32.xlu1 %v1508_v22, %s3460_s14  ;;  %v3160_v23 = vpop.f32.mrb[31].mxu1  ;;  %v2907_v26 = vmul.f32 -1.442695, %v1508_v22  ;;  %3382 = vpow2.f32 %v2906_v24 }
 0xe38   : > { %3384 = vpow2.f32 %v2907_v26 }
 0xe40   : > { %v3383_v27 = vpop.eup %3382 }
 0xe41   : > { %v1518_v30 = vadd.f32 1.0, %v3383_v27 }
 0xe42   : > { %v3385_v28 = vpop.eup %3384 }
 0xe43   : > { %v1519_v32 = vadd.f32 1.0, %v3385_v28  ;;  %3386 = vrcp.f32 %v1518_v30 }
 0xe45   : > { %3388 = vrcp.f32 %v1519_v32 }
 0xe4d   : > { %v3387_v34 = vpop.eup %3386 }
 0xe4e   : > { %v1524_v38 = vmul.f32 %v3387_v34, %v1505_v29 }
 0xe4f   : > { %v3389_v36 = vpop.eup %3388 }
 0xe50   : > { %v1525_v61 = vmul.f32 %v3389_v36, %v1508_v22 }
 0xea6   : > { %v1529_v37 = vpop.permute.xlu0 %1528 }
 0xea7   : > { %v1534_v60 = vmul.f32 %v1529_v37, %v1524_v38 }
 0xea8   : > { %v1531_v2 = vpop.permute.xlu1 %1530 }
 0xea9   : > { %v1535_v39 = vmul.f32 %v1531_v2, %v1525_v61 }
 0xeab   : > { %v1544_v40 = vpack.c.bf16 %v1535_v39, %v1534_v60 }
 0xead   : > { %3170 = vmatmul.mubr.msk.bf16.vlgmr.msra.gmra.mrb[32].mxu0 %vm1569_vm15, %v1544_v40 }
 0xeae   : > { %3190 = vmatpush3.bf16.msra.mxu0 %v3584_v10  ;;  %3193 = vmatprep.mubr.msk.bf16.mxu0 %vm3452_vm2, %v3451_v7 }
 0xeaf   : > { %3191 = vmatprep.subr.bf16.mxu0 %v3451_v7 }
 0xeb2   : > { %3192 = vmatpush3.bf16.msra.mxu0 %v3602_v25 }
 0xeb3   : > { %3203 = vmatprep.subr.bf16.mxu0 %v3451_v7 }
 0xf80   : > { %v1607_v41 = vpop.f32.mrb[32].mxu0 }
 0xf81   : > { %v3842_v42 = vadd.f32 %v1607_v41, %v3789_v47  ;;  %v3171_v43 = vpop.f32.mrb[33].mxu0  ;;  %v3332_v47 = vld [vmem:[%s4101_s7 + $0x10] sm:$0xff]  }
 0xf82   : > { %v1610_v45 = vpop.f32.mrb[34].mxu0  ;;  %3174 = vmatpush3.bf16.msra.mxu1 %v3332_v47 }
 0xf83   : > { %v3845_v44 = vadd.f32 %v1610_v45, %v3792_v50  ;;  %v3172_v46 = vpop.f32.mrb[35].mxu0  ;;  %v1618_v48 = vmul.f32 %v3842_v42, %v3842_v42  ;;  %v3333_v50 = vld [vmem:[%s4101_s7 + $0x18] sm:$0xff]   ;;  %3175 = vmatprep.subr.bf16.mxu1 %v3451_v7 }
 0xf85   : > { %v1620_v49 = vsel %vm488_vm0, %v1618_v48, 0.0  ;;  %v1619_v51 = vmul.f32 %v3845_v44, %v3845_v44 }
 0xf86   : > { %1621 = vadd.xlane.f32.xlu1 %v1620_v49  ;;  %3176 = vmatpush3.bf16.msra.mxu1 %v3333_v50 }
 0xf87   : > { %v1623_v54 = vsel %vm492_vm1, %v1619_v51, 0.0  ;;  %3181 = vmatprep.subr.bf16.mxu1 %v3451_v7 }
 0xf88   : > { %1624 = vadd.xlane.f32.xlu0 %v1623_v54 }
0x1013   : > { %v1622_v55 = vpop.xlane.xlu1 %1621 }
0x1014   : > { %v1626_v56 = vmul.f32 0.03125, %v1622_v55 }
0x1015   : > { %v1625_v0 = vpop.xlane.xlu0 %1624 }
0x1016   : > { %v1628_v1 = vadd.f32 1e-06, %v1626_v56  ;;  %v1627_v57 = vmul.f32 0.03125, %v1625_v0 }
0x1018   : > { %3390 = vrsqrt.f32 %v1628_v1  ;;  %v1629_v58 = vadd.f32 1e-06, %v1627_v57 }
0x101a   : > { %3392 = vrsqrt.f32 %v1629_v58 }
0x1022   : > { %v3391_v59 = vpop.eup %3390 }
0x1023   : > { %v1632_v62 = vmul.f32 %v3391_v59, %v3842_v42 }
0x1024   : > { %v3393_v63 = vpop.eup %3392 }
0x1025   : > { %v1633_v4 = vmul.f32 %v3393_v63, %v3845_v44  ;;  %v1640_v5 = vmul.f32 %v2914_v3, %v1632_v62 }
0x1027   : > { %v1641_v6 = vmul.f32 %v2914_v3, %v1633_v4 }
0x1029   : > { %v1647_v8 = vpack.c.bf16 %v1641_v6, %v1640_v5 }
0x102b   : > { %3178 = vmatmul.mubr.msk.bf16.vlgmr.msra.gmra.mrb[32].mxu1 %vm488_vm0, %v1647_v8 }
0x102c   : > { %3182 = vmatpush3.bf16.msra.mxu1 %v3584_v10  ;;  %3185 = vmatprep.mubr.msk.bf16.mxu1 %vm3452_vm2, %v3451_v7 }
0x102d   : > { %3183 = vmatprep.subr.bf16.mxu1 %v3451_v7 }
0x1030   : > { %3184 = vmatpush3.bf16.msra.mxu1 %v3602_v25 }
0x1031   : > { %3197 = vmatprep.subr.bf16.mxu1 %v3451_v7 }
0x10fe   : > { %v1697_v9 = vpop.f32.mrb[32].mxu1 }
0x10ff   : > { %v3179_v11 = vpop.f32.mrb[33].mxu1  ;;  %v1704_v17 = vmul.f32 %v1697_v9, %v3619_v31  ;;  %v1755_v61 = vmul.f32 %v1697_v9, %v3645_v52 }
0x1100   : > { %v1700_v12 = vpop.f32.mrb[34].mxu1 }
0x1101   : > { %v3873_v14 = vpack.c.bf16 %v1700_v12, %v1697_v9  ;;  %v3180_v15 = vpop.f32.mrb[35].mxu1  ;;  %v1705_v22 = vmul.f32 %v3442_v21, %v1700_v12  ;;  %v1756_v2 = vmul.f32 %v1700_v12, %v3647_v53 }
0x1103   : > { %1758 = vrot.lane.b32.xlu1 %v3873_v14, %s3454_s30  ;;  %3186 = vmatmul.mubr.msk.bf16.vlgmr.msra.gmra.mrb[36].mxu1 %vm488_vm0, %v3873_v14 }
0x1104   : > { %3199 = vmatprep.mubr.msk.bf16.mxu1 %vm3452_vm2, %v3451_v7 }
0x1175   : > { %v1759_v10 = vpop.permute.xlu1 %1758 }
0x1176   : > { %3194 = vmatmul.mubr.msk.bf16.vlgmr.msra.gmra.mrb[36].mxu0 %vm488_vm0, %v1759_v10 }
0x1177   : > { %3205 = vmatprep.mubr.msk.bf16.mxu0 %vm3452_vm2, %v3451_v7 }
0x11d6   : > { %v1744_v25 = vpop.f32.mrb[36].mxu1 }
0x11d7   : > { %v1751_v18 = vmul.f32 %v1744_v25, %v3629_v33  ;;  %v3187_v19 = vpop.f32.mrb[37].mxu1 }
0x11d8   : > { %v1747_v29 = vpop.f32.mrb[38].mxu1 }
0x11d9   : > { %v1753_v23 = vadd.f32 %v1751_v18, %v1704_v17  ;;  %v1752_v24 = vmul.f32 %v1747_v29, %v3634_v35  ;;  %v3188_v26 = vpop.f32.mrb[39].mxu1 }
0x11db   : > { %v1754_v27 = vadd.f32 %v1752_v24, %v1705_v22 }
0x11dd   : > { %v3890_v28 = vpack.c.bf16 %v1754_v27, %v1753_v23 }
0x1249   : > { %v1797_v30 = vpop.f32.mrb[36].mxu0 }
0x124a   : > { %v1804_v32 = vmul.f32 %v1797_v30, %v3629_v33  ;;  %v3195_v31 = vpop.f32.mrb[37].mxu0 }
0x124b   : > { %v1800_v34 = vpop.f32.mrb[38].mxu0 }
0x124c   : > { %v1805_v36 = vmul.f32 %v1800_v34, %v3634_v35  ;;  %1808 = vrot.lane.b32.xlu0 %v1804_v32, %s3453_s22  ;;  %v3196_v37 = vpop.f32.mrb[39].mxu0 }
0x124e   : > { %1810 = vrot.lane.b32.xlu1 %v1805_v36, %s3453_s22 }
0x1250   : > { %1951 = vrot.lane.b32.xlu0 %v3890_v28, %s3456_s21  ;;  %s4117_s21 = sshll.u32 %s4119_s26, 4 }
0x12be   : > { %v1809_v38 = vpop.permute.xlu0 %1808 }
0x12bf   : > { %v1814_v39 = vadd.f32 %v1809_v38, %v1755_v61 }
0x12c0   : > { %v1811_v60 = vpop.permute.xlu1 %1810 }
0x12c1   : > { %v1815_v33 = vadd.f32 %v1811_v60, %v1756_v2 }
0x12c2   : > { %v1952_v43 = vpop.permute.xlu0 %1951 }
0x12c3   : > { %v3900_v40 = vpack.c.bf16 %v1815_v33, %v1814_v39 }
0x12c5   : > { %1824 = vrot.lane.b32.xlu1 %v3900_v40, %s3454_s30 }
0x12c9   : > { %1953 = vrot.lane.b32.xlu1 %v3900_v40, %s3455_s20 }
0x1337   : > { %v1825_v35 = vpop.permute.xlu1 %1824 }
0x1338   : > { %v1830_v41 = vsel %vm715_vm3, %v1825_v35, 0 }
0x1339   : > { %3198 = vmatpush3.bf16.xpose.msra.mxu1 %v1830_v41 }
0x133a   : > { %3209 = vmatprep.subr.bf16.mxu1 %v3451_v7 }
0x133b   : > { %v1954_v52 = vpop.permute.xlu1 %1953 }
0x133c   : > { %v1959_v53 = vsel %vm715_vm3, %v1954_v52, 0 }
0x1340   : > { %3200 = vmatmul.mubr.msk.bf16.vlgmr.msra.gmra.mrb[40].mxu1 %vm715_vm3, %v3890_v28 }
0x1341   : > { %3210 = vmatpush3.bf16.xpose.msra.mxu1 %v1959_v53  ;;  %3211 = vmatprep.mubr.msk.bf16.mxu1 %vm3452_vm2, %v3451_v7 }
0x1342   : > { %3221 = vmatprep.subr.bf16.mxu1 %v3451_v7 }
0x1348   : > { %3212 = vmatmul.mubr.msk.bf16.vlgmr.msra.gmra.mrb[44].mxu1 %vm715_vm3, %v1952_v43 }
0x1349   : > { %3223 = vmatprep.mubr.msk.bf16.mxu1 %vm3452_vm2, %v3451_v7 }
0x1413   : > { %v1866_v45 = vpop.f32.mrb[40].mxu1 }
0x1414   : > { %v1873_v46 = vmul.f32 0.35355338, %v1866_v45  ;;  %v3201_v48 = vpop.f32.mrb[41].mxu1 }
0x1415   : > { %v1869_v49 = vpop.f32.mrb[42].mxu1 }
0x1416   : > { %v1874_v51 = vmul.f32 0.35355338, %v1869_v49  ;;  %v3202_v54 = vpop.f32.mrb[43].mxu1  ;;  %v1875_v47 = vadd.f32 %v1873_v46, %v3674_v16  ;;  %v2924_v49 = vld [vmem:[%s4102_s8 + $0x10] sm:$0xf] }
0x1417   : > { %v2925_v54 = vld [vmem:[%s4102_s8 + $0x14] sm:$0xf] }
0x1418   : > { %v1877_v50 = vsel %vm767_vm10, %v1875_v47, -inf  ;;  %v1876_v55 = vadd.f32 %v1874_v51, %v3676_v20  ;;  %v2130_v51 = vsel %vm978_vm14, %v2924_v49, 0 }
0x1419   : > { %1878 = vmax.xlane.f32.xlu1 %v1877_v50 }
0x141a   : > { %v1880_v56 = vsel %vm771_vm11, %v1876_v55, -inf }
0x141b   : > { %1881 = vmax.xlane.f32.xlu0 %v1880_v56  ;;  %v1995_v0 = vpop.f32.mrb[44].mxu1 }
0x141c   : > { %v2002_v1 = vmul.f32 0.35355338, %v1995_v0  ;;  %v3213_v57 = vpop.f32.mrb[45].mxu1 }
0x141d   : > { %v1998_v58 = vpop.f32.mrb[46].mxu1 }
0x141e   : > { %v2003_v59 = vmul.f32 0.35355338, %v1998_v58  ;;  %v3214_v62 = vpop.f32.mrb[47].mxu1  ;;  %v2004_v63 = vadd.f32 %v2002_v1, %v3674_v16 }
0x1420   : > { %v2006_v3 = vsel %vm767_vm10, %v2004_v63, -inf  ;;  %v2005_v4 = vadd.f32 %v2003_v59, %v3676_v20 }
0x1421   : > { %2007 = vmax.xlane.f32.xlu0 %v2006_v3 }
0x1422   : > { %v2009_v5 = vsel %vm771_vm11, %v2005_v4, -inf }
0x1423   : > { %2010 = vmax.xlane.f32.xlu1 %v2009_v5 }
0x14a6   : > { %v1879_v6 = vpop.xlane.xlu1 %1878 }
0x14a7   : > { %v1883_v8 = vsub.f32 %v1875_v47, %v1879_v6  ;;  %v2083_v47 = vsel %vm978_vm14, %v2925_v54, 0  ;;  %v2926_v54 = vld [vmem:[%s4102_s8 + $0x18] sm:$0xf] }
0x14a8   : > { %v1882_v9 = vpop.xlane.xlu0 %1881  ;;  %3222 = vmatpush3.bf16.msra.mxu1 %v2083_v47  ;;  %v2305_v47 = vsel %vm978_vm14, %v2926_v54, 0 }
0x14a9   : > { %v1885_v11 = vmul.f32 1.442695, %v1883_v8  ;;  %v1884_v12 = vsub.f32 %v1876_v55, %v1882_v9  ;;  %3233 = vmatprep.subr.bf16.mxu1 %v3451_v7 }
0x14ab   : > { %3394 = vpow2.f32 %v1885_v11  ;;  %v1887_v15 = vmul.f32 1.442695, %v1884_v12 }
0x14ad   : > { %3396 = vpow2.f32 %v1887_v15 }
0x14ae   : > { %v2008_v10 = vpop.xlane.xlu0 %2007 }
0x14af   : > { %v2012_v25 = vsub.f32 %v2004_v63, %v2008_v10 }
0x14b0   : > { %v2011_v17 = vpop.xlane.xlu1 %2010 }
0x14b1   : > { %v2014_v18 = vmul.f32 1.442695, %v2012_v25  ;;  %v2013_v19 = vsub.f32 %v2005_v4, %v2011_v17 }
0x14b3   : > { %3398 = vpow2.f32 %v2014_v18  ;;  %v2016_v29 = vmul.f32 1.442695, %v2013_v19 }
0x14b5   : > { %v3395_v21 = vpop.eup %3394  ;;  %3400 = vpow2.f32 %v2016_v29 }
0x14b6   : > { %v1889_v22 = vsel %vm767_vm10, %v3395_v21, 0.0 }
0x14b7   : > { %v3397_v23 = vpop.eup %3396  ;;  %1890 = vadd.xlane.f32.xlu0 %v1889_v22 }
0x14b8   : > { %v1892_v24 = vsel %vm771_vm11, %v3397_v23, 0.0 }
0x14b9   : > { %1893 = vadd.xlane.f32.xlu1 %v1892_v24 }
0x14bd   : > { %v3399_v26 = vpop.eup %3398 }
0x14be   : > { %v2018_v27 = vsel %vm767_vm10, %v3399_v26, 0.0 }
0x14bf   : > { %v3401_v30 = vpop.eup %3400  ;;  %2019 = vadd.xlane.f32.xlu0 %v2018_v27 }
0x14c0   : > { %v2021_v32 = vsel %vm771_vm11, %v3401_v30, 0.0 }
0x14c1   : > { %2022 = vadd.xlane.f32.xlu1 %v2021_v32 }
0x14d2   : > { %2029 = vrot.lane.b32.xlu1 %v3873_v14, %s3459_s29  ;;  %s4113_s29 = smov 72  }
0x14d5   : > { %1900 = vrot.lane.b32.xlu0 %v3873_v14, %s3460_s14 }
0x14d6   : > { %2175 = vrot.lane.b32.xlu1 %v3900_v40, %s3461_s15  ;;  %s4114_s15 = smov 48  }
0x14d9   : > { %2173 = vrot.lane.b32.xlu0 %v3890_v28, %s3462_s16  ;;  %s4115_s16 = smov 104  }
0x1544   : > { %v1891_v31 = vpop.xlane.xlu0 %1890 }
0x1545   : > { %3402 = vrcp.f32 %v1891_v31 }
0x1546   : > { %v1894_v34 = vpop.xlane.xlu1 %1893 }
0x1547   : > { %3404 = vrcp.f32 %v1894_v34 }
0x154c   : > { %v2020_v36 = vpop.xlane.xlu0 %2019 }
0x154d   : > { %3406 = vrcp.f32 %v2020_v36 }
0x154e   : > { %v2023_v37 = vpop.xlane.xlu1 %2022 }
0x154f   : > { %v3403_v38 = vpop.eup %3402  ;;  %3408 = vrcp.f32 %v2023_v37 }
0x1550   : > { %v1901_v61 = vpop.permute.xlu0 %1900  ;;  %v1897_v39 = vmul.f32 %v3403_v38, %v3395_v21 }
0x1551   : > { %v3405_v2 = vpop.eup %3404  ;;  %v1906_v60 = vand.u32 %v1901_v61, %v3698_v13 }
0x1552   : > { %v1898_v33 = vmul.f32 %v3405_v2, %v3397_v23  ;;  %v2030_v35 = vpop.permute.xlu1 %2029 }
0x1553   : > { %3204 = vmatpush3.bf16.msra.mxu0 %v1906_v60  ;;  %v2035_v52 = vand.u32 %v2030_v35, %v3698_v13 }
0x1554   : > { %v1899_v41 = vpack.c.bf16 %v1898_v33, %v1897_v39  ;;  %3215 = vmatprep.subr.bf16.mxu0 %v3451_v7  ;;  %v2174_v5 = vpop.permute.xlu0 %2173 }
0x1556   : > { %3206 = vmatmul.mubr.msk.bf16.vlgmr.msra.gmra.mrb[40].mxu0 %vm767_vm10, %v1899_v41  ;;  %v2176_v59 = vpop.permute.xlu1 %2175 }
0x1557   : > { %v3407_v53 = vpop.eup %3406  ;;  %3216 = vmatpush3.bf16.msra.mxu0 %v2035_v52  ;;  %3217 = vmatprep.mubr.msk.bf16.mxu0 %vm3452_vm2, %v3451_v7  ;;  %v2181_v4 = vsel %vm715_vm3, %v2176_v59, 0 }
0x1558   : > { %3227 = vmatprep.subr.bf16.mxu0 %v3451_v7  ;;  %v2026_v45 = vmul.f32 %v3407_v53, %v3399_v26 }
0x1559   : > { %v3409_v43 = vpop.eup %3408 }
0x155a   : > { %v2027_v46 = vmul.f32 %v3409_v43, %v3401_v30 }
0x155c   : > { %v2028_v48 = vpack.c.bf16 %v2027_v46, %v2026_v45 }
0x155e   : > { %3218 = vmatmul.mubr.msk.bf16.vlgmr.msra.gmra.mrb[44].mxu0 %vm767_vm10, %v2028_v48 }
0x155f   : > { %3229 = vmatprep.mubr.msk.bf16.mxu0 %vm3452_vm2, %v3451_v7  ;;  %3228 = vmatpush3.bf16.msra.mxu0 %v2130_v51 }
0x1560   : > { %3239 = vmatprep.subr.bf16.mxu0 %v3451_v7 }
0x1629   : > { %v1942_v50 = vpop.f32.mrb[40].mxu0 }
0x162a   : > { %v3207_v55 = vpop.f32.mrb[41].mxu0 }
0x162b   : > { %v1945_v56 = vpop.f32.mrb[42].mxu0 }
0x162c   : > { %v1949_v0 = vpack.c.bf16 %v1945_v56, %v1942_v50  ;;  %v3208_v1 = vpop.f32.mrb[43].mxu0 }
0x162e   : > { %3230 = vmatmul.mubr.msk.bf16.vlgmr.msra.gmra.mrb[48].mxu0 %vm715_vm3, %v1949_v0 }
0x162f   : > { %3241 = vmatprep.mubr.msk.bf16.mxu0 %vm3452_vm2, %v3451_v7 }
0x1631   : > { %v2071_v57 = vpop.f32.mrb[44].mxu0 }
0x1632   : > { %v3219_v58 = vpop.f32.mrb[45].mxu0 }
0x1633   : > { %v2074_v62 = vpop.f32.mrb[46].mxu0 }
0x1634   : > { %v2078_v63 = vpack.c.bf16 %v2074_v62, %v2071_v57  ;;  %v3220_v3 = vpop.f32.mrb[47].mxu0 }
0x1636   : > { %3224 = vmatmul.mubr.msk.bf16.vlgmr.msra.gmra.mrb[48].mxu1 %vm715_vm3, %v2078_v63 }
0x1637   : > { %3234 = vmatpush3.bf16.xpose.msra.mxu1 %v2181_v4  ;;  %3235 = vmatprep.mubr.msk.bf16.mxu1 %vm3452_vm2, %v3451_v7 }
0x1638   : > { %3245 = vmatprep.subr.bf16.mxu1 %v3451_v7 }
0x163e   : > { %3236 = vmatmul.mubr.msk.bf16.vlgmr.msra.gmra.mrb[52].mxu1 %vm715_vm3, %v2174_v5 }
0x163f   : > { %3247 = vmatprep.mubr.msk.bf16.mxu1 %vm3452_vm2, %v3451_v7  ;;  %3246 = vmatpush3.bf16.msra.mxu1 %v2305_v47 }
0x1640   : > { %3257 = vmatprep.subr.bf16.mxu1 %v3451_v7 }
0x1701   : > { %v2166_v6 = vpop.f32.mrb[48].mxu0 }
0x1702   : > { %v3231_v8 = vpop.f32.mrb[49].mxu0 }
0x1703   : > { %v2169_v9 = vpop.f32.mrb[50].mxu0 }
0x1704   : > { %v3232_v11 = vpop.f32.mrb[51].mxu0 }
0x1709   : > { %v2119_v12 = vpop.f32.mrb[48].mxu1 }
0x170a   : > { %v3968_v15 = vadd.f32 %v2166_v6, %v2119_v12  ;;  %v3225_v10 = vpop.f32.mrb[49].mxu1 }
0x170b   : > { %v2122_v25 = vpop.f32.mrb[50].mxu1 }
0x170c   : > { %v3970_v17 = vadd.f32 %v2169_v9, %v2122_v25  ;;  %v3226_v18 = vpop.f32.mrb[51].mxu1 }
0x1711   : > { %v2217_v19 = vpop.f32.mrb[52].mxu1 }
0x1712   : > { %v2224_v29 = vmul.f32 0.35355338, %v2217_v19  ;;  %v3237_v21 = vpop.f32.mrb[53].mxu1 }
0x1713   : > { %v2220_v22 = vpop.f32.mrb[54].mxu1 }
0x1714   : > { %v2225_v23 = vmul.f32 0.35355338, %v2220_v22  ;;  %v3238_v24 = vpop.f32.mrb[55].mxu1  ;;  %v2226_v26 = vadd.f32 %v2224_v29, %v3674_v16 }
0x1716   : > { %v2228_v27 = vsel %vm767_vm10, %v2226_v26, -inf  ;;  %v2227_v30 = vadd.f32 %v2225_v23, %v3676_v20 }
0x1717   : > { %2229 = vmax.xlane.f32.xlu1 %v2228_v27 }
0x1718   : > { %v2231_v32 = vsel %vm771_vm11, %v2227_v30, -inf }
0x1719   : > { %2232 = vmax.xlane.f32.xlu0 %v2231_v32 }
0x17a4   : > { %v2230_v31 = vpop.xlane.xlu1 %2229 }
0x17a5   : > { %v2234_v34 = vsub.f32 %v2226_v26, %v2230_v31 }
0x17a6   : > { %v2233_v36 = vpop.xlane.xlu0 %2232 }
0x17a7   : > { %v2236_v37 = vmul.f32 1.442695, %v2234_v34  ;;  %v2235_v38 = vsub.f32 %v2227_v30, %v2233_v36 }
0x17a9   : > { %3410 = vpow2.f32 %v2236_v37  ;;  %v2238_v61 = vmul.f32 1.442695, %v2235_v38 }
0x17ab   : > { %3412 = vpow2.f32 %v2238_v61 }
0x17b3   : > { %v3411_v2 = vpop.eup %3410 }
0x17b4   : > { %v2240_v60 = vsel %vm767_vm10, %v3411_v2, 0.0 }
0x17b5   : > { %v3413_v39 = vpop.eup %3412  ;;  %2241 = vadd.xlane.f32.xlu0 %v2240_v60 }
0x17b6   : > { %v2243_v33 = vsel %vm771_vm11, %v3413_v39, 0.0 }
0x17b7   : > { %2244 = vadd.xlane.f32.xlu1 %v2243_v33 }
0x17c8   : > { %2352 = vrot.lane.b32.xlu1 %v3900_v40, %s4113_s29 }
0x17cb   : > { %2251 = vrot.lane.b32.xlu0 %v3873_v14, %s4114_s15 }
0x17cc   : > { %2350 = vrot.lane.b32.xlu1 %v3890_v28, %s4115_s16  ;;  %s454_s16 = scalar_lea.vmem %s4107_s13, %s4117_s21 }
0x1842   : > { %v2242_v35 = vpop.xlane.xlu0 %2241 }
0x1843   : > { %3414 = vrcp.f32 %v2242_v35 }
0x1844   : > { %v2245_v41 = vpop.xlane.xlu1 %2244 }
0x1845   : > { %3416 = vrcp.f32 %v2245_v41 }
0x1846   : > { %v2252_v52 = vpop.permute.xlu0 %2251 }
0x1847   : > { %v2257_v53 = vand.u32 %v2252_v52, %v3698_v13 }
0x1848   : > { %v2353_v48 = vpop.permute.xlu1 %2352 }
0x1849   : > { %3240 = vmatpush3.bf16.msra.mxu0 %v2257_v53  ;;  %v2358_v51 = vsel %vm715_vm3, %v2353_v48, 0 }
0x184a   : > { %3251 = vmatprep.subr.bf16.mxu0 %v3451_v7 }
0x184c   : > { %v2351_v28 = vpop.permute.xlu1 %2350 }
0x184d   : > { %v3415_v43 = vpop.eup %3414 }
0x184e   : > { %v2248_v46 = vmul.f32 %v3415_v43, %v3411_v2 }
0x184f   : > { %v3417_v45 = vpop.eup %3416 }
0x1850   : > { %v2249_v40 = vmul.f32 %v3417_v45, %v3413_v39 }
0x1852   : > { %v2250_v49 = vpack.c.bf16 %v2249_v40, %v2248_v46 }
0x1854   : > { %3242 = vmatmul.mubr.msk.bf16.vlgmr.msra.gmra.mrb[52].mxu0 %vm767_vm10, %v2250_v49 }
0x1855   : > { %3252 = vmatpush3.bf16.xpose.msra.mxu0 %v2358_v51  ;;  %3253 = vmatprep.mubr.msk.bf16.mxu0 %vm3452_vm2, %v3451_v7 }
0x1856   : > { %3263 = vmatprep.subr.bf16.mxu0 %v3451_v7 }
0x185c   : > { %3254 = vmatmul.mubr.msk.bf16.vlgmr.msra.gmra.mrb[56].mxu0 %vm715_vm3, %v2351_v28 }
0x185d   : > { %3265 = vmatprep.mubr.msk.bf16.mxu0 %vm3452_vm2, %v3451_v7 }
0x1927   : > { %v2293_v50 = vpop.f32.mrb[52].mxu0 }
0x1928   : > { %v3243_v55 = vpop.f32.mrb[53].mxu0 }
0x1929   : > { %v2296_v56 = vpop.f32.mrb[54].mxu0 }
0x192a   : > { %v2300_v0 = vpack.c.bf16 %v2296_v56, %v2293_v50  ;;  %v3244_v1 = vpop.f32.mrb[55].mxu0 }
0x192c   : > { %3248 = vmatmul.mubr.msk.bf16.vlgmr.msra.gmra.mrb[56].mxu1 %vm715_vm3, %v2300_v0 }
0x192d   : > { %3259 = vmatprep.mubr.msk.bf16.mxu1 %vm3452_vm2, %v3451_v7 }
0x192f   : > { %v2394_v57 = vpop.f32.mrb[56].mxu0 }
0x1930   : > { %v2401_v58 = vmul.f32 0.35355338, %v2394_v57  ;;  %v3255_v59 = vpop.f32.mrb[57].mxu0 }
0x1931   : > { %v2397_v62 = vpop.f32.mrb[58].mxu0  ;;  %v2941_v59 = vld [vmem:[%s4100_s6 + $0x1] ss:$0 sm:$0xff] }
0x1932   : > { %v2402_v63 = vmul.f32 0.35355338, %v2397_v62  ;;  %v3256_v3 = vpop.f32.mrb[59].mxu0  ;;  %v2403_v4 = vadd.f32 %v2401_v58, %v3674_v16 }
0x1934   : > { %v2405_v5 = vsel %vm767_vm10, %v2403_v4, -inf  ;;  %v2404_v6 = vadd.f32 %v2402_v63, %v3676_v20 }
0x1935   : > { %2406 = vmax.xlane.f32.xlu0 %v2405_v5  ;;  %v3336_v5 = vld [vmem:[%s4104_s10 + $0x20] sm:$0xff]  }
0x1936   : > { %v2408_v8 = vsel %vm771_vm11, %v2404_v6, -inf }
0x1937   : > { %2409 = vmax.xlane.f32.xlu1 %v2408_v8  ;;  %v3338_v8 = vld [vmem:[%s4104_s10 + $0x30] sm:$0xff]  }
0x1948   : > { %2428 = vrot.lane.b32.xlu1 %v3873_v14, %s4116_s19 }
0x19c2   : > { %v2407_v9 = vpop.xlane.xlu0 %2406 }
0x19c3   : > { %v2411_v11 = vsub.f32 %v2403_v4, %v2407_v9  ;;  %v3339_v9 = vld [vmem:[%s4104_s10 + $0x38] sm:$0xff]  }
0x19c4   : > { %v2410_v12 = vpop.xlane.xlu1 %2409 }
0x19c5   : > { %v2413_v10 = vmul.f32 1.442695, %v2411_v11  ;;  %v2412_v25 = vsub.f32 %v2404_v6, %v2410_v12  ;;  %v3337_v6 = vld [vmem:[%s4104_s10 + $0x28] sm:$0xff]  }
0x19c7   : > { %3418 = vpow2.f32 %v2413_v10  ;;  %v2415_v18 = vmul.f32 1.442695, %v2412_v25 }
0x19c8   : > { %v2429_v19 = vpop.permute.xlu1 %2428 }
0x19c9   : > { %3420 = vpow2.f32 %v2415_v18  ;;  %v2434_v16 = vand.u32 %v2429_v19, %v3698_v13 }
0x19cb   : > { %3258 = vmatpush3.bf16.msra.mxu1 %v2434_v16 }
0x19cc   : > { %3269 = vmatprep.subr.bf16.mxu1 %v3451_v7 }
0x19d1   : > { %v3419_v20 = vpop.eup %3418 }
0x19d2   : > { %v2417_v29 = vsel %vm767_vm10, %v3419_v20, 0.0 }
0x19d3   : > { %v3421_v21 = vpop.eup %3420  ;;  %2418 = vadd.xlane.f32.xlu0 %v2417_v29 }
0x19d4   : > { %v2420_v14 = vsel %vm771_vm11, %v3421_v21, 0.0 }
0x19d7   : > { %2421 = vadd.xlane.f32.xlu0 %v2420_v14 }
0x19ff   : > { %v2341_v22 = vpop.f32.mrb[56].mxu1 }
0x1a00   : > { %v2348_v23 = vadd.f32 %v2341_v22, %v3968_v15  ;;  %v3249_v24 = vpop.f32.mrb[57].mxu1  ;;  %v2927_v15 = vld [vmem:[%s4102_s8 + $0x1c] sm:$0xf] }
0x1a01   : > { %v2344_v26 = vpop.f32.mrb[58].mxu1 }
0x1a02   : > { %v2349_v27 = vadd.f32 %v2344_v26, %v3970_v17  ;;  %v3250_v30 = vpop.f32.mrb[59].mxu1  ;;  %v2482_v17 = vsel %vm978_vm14, %v2927_v15, 0 }
0x1a03   : > { %3264 = vmatpush3.bf16.msra.mxu0 %v2482_v17 }
0x1a04   : > { %3277 = vmatprep.subr.bf16.mxu0 %v3451_v7 }
0x1a60   : > { %v2419_v13 = vpop.xlane.xlu0 %2418 }
0x1a61   : > { %3422 = vrcp.f32 %v2419_v13 }
0x1a64   : > { %v2422_v32 = vpop.xlane.xlu0 %2421 }
0x1a65   : > { %3424 = vrcp.f32 %v2422_v32 }
0x1a6b   : > { %v3423_v31 = vpop.eup %3422 }
0x1a6c   : > { %v2425_v36 = vmul.f32 %v3423_v31, %v3419_v20 }
0x1a6f   : > { %v3425_v34 = vpop.eup %3424 }
0x1a70   : > { %v2426_v37 = vmul.f32 %v3425_v34, %v3421_v21 }
0x1a72   : > { %v2427_v38 = vpack.c.bf16 %v2426_v37, %v2425_v36 }
0x1a74   : > { %3260 = vmatmul.mubr.msk.bf16.vlgmr.msra.gmra.mrb[60].mxu1 %vm767_vm10, %v2427_v38 }
0x1a75   : > { %3273 = vmatprep.mubr.msk.bf16.mxu1 %vm3452_vm2, %v3451_v7 }
0x1b47   : > { %v2470_v61 = vpop.f32.mrb[60].mxu1 }
0x1b48   : > { %v3261_v2 = vpop.f32.mrb[61].mxu1 }
0x1b49   : > { %v2473_v60 = vpop.f32.mrb[62].mxu1 }
0x1b4a   : > { %v2477_v39 = vpack.c.bf16 %v2473_v60, %v2470_v61  ;;  %v3262_v33 = vpop.f32.mrb[63].mxu1 }
0x1b4b   : > { %v3341_v33 = vld [vmem:[%s4106_s12 + $0x8] sm:$0xff]  }
0x1b4c   : > { %3266 = vmatmul.mubr.msk.bf16.vlgmr.msra.gmra.mrb[60].mxu0 %vm715_vm3, %v2477_v39  ;;  %v3340_v39 = vld [vmem:[%s4106_s12] sm:$0xff]  }
0x1b4d   : > { %3285 = vmatprep.mubr.msk.bf16.mxu0 %vm3452_vm2, %v3451_v7  ;;  %3278 = vmatpush3.bf16.msra.mxu0 %v3336_v5 }
0x1b4e   : > { %3279 = vmatprep.subr.bf16.mxu0 %v3451_v7 }
0x1b51   : > { %3280 = vmatpush3.bf16.msra.mxu0 %v3337_v6 }
0x1b52   : > { %3281 = vmatprep.subr.bf16.mxu0 %v3451_v7 }
0x1b55   : > { %3282 = vmatpush3.bf16.msra.mxu0 %v3338_v8 }
0x1b56   : > { %3283 = vmatprep.subr.bf16.mxu0 %v3451_v7 }
0x1b59   : > { %3284 = vmatpush3.bf16.msra.mxu0 %v3339_v9 }
0x1c1f   : > { %v2518_v35 = vpop.f32.mrb[60].mxu0 }
0x1c20   : > { %v2525_v41 = vadd.f32 %v2518_v35, %v2348_v23  ;;  %v3267_v52 = vpop.f32.mrb[61].mxu0 }
0x1c21   : > { %v2521_v53 = vpop.f32.mrb[62].mxu0 }
0x1c22   : > { %v4026_v43 = vadd.f32 %v2525_v41, %v3842_v42  ;;  %v2526_v45 = vadd.f32 %v2521_v53, %v2349_v27  ;;  %v3268_v46 = vpop.f32.mrb[63].mxu0  ;;  %v3334_v42 = vld [vmem:[%s4103_s9 + $0x10] sm:$0xff]  }
0x1c23   : > { %3270 = vmatpush3.bf16.msra.mxu1 %v3334_v42 }
0x1c24   : > { %v4029_v40 = vadd.f32 %v2526_v45, %v3845_v44  ;;  %v2531_v48 = vmul.f32 %v4026_v43, %v4026_v43  ;;  %v3335_v44 = vld [vmem:[%s4103_s9 + $0x18] sm:$0xff]   ;;  %3271 = vmatprep.subr.bf16.mxu1 %v3451_v7 }
0x1c26   : > { %v2533_v49 = vsel %vm488_vm0, %v2531_v48, 0.0  ;;  %v2532_v51 = vmul.f32 %v4029_v40, %v4029_v40 }
0x1c27   : > { %2534 = vadd.xlane.f32.xlu0 %v2533_v49  ;;  %3272 = vmatpush3.bf16.msra.mxu1 %v3335_v44 }
0x1c28   : > { %v2536_v28 = vsel %vm492_vm1, %v2532_v51, 0.0  ;;  %3289 = vmatprep.subr.bf16.mxu1 %v3451_v7 }
0x1c2b   : > { %2537 = vadd.xlane.f32.xlu0 %v2536_v28 }
0x1cb4   : > { %v2535_v54 = vpop.xlane.xlu0 %2534 }
0x1cb5   : > { %v2539_v47 = vmul.f32 0.03125, %v2535_v54 }
0x1cb7   : > { %v2541_v50 = vadd.f32 1e-06, %v2539_v47 }
0x1cb8   : > { %v2538_v55 = vpop.xlane.xlu0 %2537 }
0x1cb9   : > { %3426 = vrsqrt.f32 %v2541_v50  ;;  %v2540_v56 = vmul.f32 0.03125, %v2538_v55 }
0x1cbb   : > { %v2542_v0 = vadd.f32 1e-06, %v2540_v56 }
0x1cbd   : > { %3428 = vrsqrt.f32 %v2542_v0 }
0x1cc3   : > { %v3427_v1 = vpop.eup %3426 }
0x1cc4   : > { %v2545_v57 = vmul.f32 %v3427_v1, %v4026_v43 }
0x1cc6   : > { %v2553_v63 = vmul.f32 %v2941_v59, %v2545_v57 }
0x1cc7   : > { %v3429_v58 = vpop.eup %3428 }
0x1cc8   : > { %v2546_v62 = vmul.f32 %v3429_v58, %v4029_v40 }
0x1cca   : > { %v2554_v3 = vmul.f32 %v2941_v59, %v2546_v62 }
0x1ccc   : > { %v2560_v4 = vpack.c.bf16 %v2554_v3, %v2553_v63 }
0x1cce   : > { %3274 = vmatmul.mubr.msk.bf16.vlgmr.msra.gmra.mrb[64].mxu1 %vm488_vm0, %v2560_v4 }
0x1ccf   : > { %3293 = vmatprep.mubr.msk.bf16.mxu1 %vm3452_vm2, %v3451_v7  ;;  %3290 = vmatpush3.bf16.msra.mxu1 %v3340_v39 }
0x1cd0   : > { %3291 = vmatprep.subr.bf16.mxu1 %v3451_v7  ;;  %v2964_v7 = vld [vmem:[%s4105_s11] ss:$0 sm:$0xff] }
0x1cd3   : > { %3292 = vmatpush3.bf16.msra.mxu1 %v3341_v33 }
0x1da1   : > { %v2610_v11 = vpop.f32.mrb[64].mxu1 }
0x1da2   : > { %2633 = vrot.lane.b32.xlu0 %v2610_v11, %s3460_s14  ;;  %v3275_v12 = vpop.f32.mrb[65].mxu1  ;;  %v2949_v18 = vmul.f32 -1.442695, %v2610_v11 }
0x1da3   : > { %v2613_v10 = vpop.f32.mrb[66].mxu1 }
0x1da4   : > { %2635 = vrot.lane.b32.xlu1 %v2613_v10, %s3460_s14  ;;  %v3276_v25 = vpop.f32.mrb[67].mxu1  ;;  %v2950_v19 = vmul.f32 -1.442695, %v2613_v10  ;;  %3430 = vpow2.f32 %v2949_v18 }
0x1da6   : > { %3432 = vpow2.f32 %v2950_v19 }
0x1dae   : > { %v3431_v16 = vpop.eup %3430 }
0x1daf   : > { %v2623_v29 = vadd.f32 1.0, %v3431_v16 }
0x1db0   : > { %v3433_v20 = vpop.eup %3432 }
0x1db1   : > { %v2624_v21 = vadd.f32 1.0, %v3433_v20  ;;  %3434 = vrcp.f32 %v2623_v29 }
0x1db3   : > { %3436 = vrcp.f32 %v2624_v21 }
0x1dbb   : > { %v3435_v14 = vpop.eup %3434 }
0x1dbc   : > { %v2629_v24 = vmul.f32 %v3435_v14, %v2610_v11 }
0x1dbd   : > { %v3437_v22 = vpop.eup %3436 }
0x1dbe   : > { %v2630_v26 = vmul.f32 %v3437_v22, %v2613_v10 }
0x1e14   : > { %v2634_v23 = vpop.permute.xlu0 %2633 }
0x1e15   : > { %v2639_v30 = vmul.f32 %v2634_v23, %v2629_v24 }
0x1e16   : > { %v2636_v27 = vpop.permute.xlu1 %2635 }
0x1e17   : > { %v2640_v13 = vmul.f32 %v2636_v27, %v2630_v26 }
0x1e19   : > { %v2650_v32 = vpack.c.bf16 %v2640_v13, %v2639_v30 }
0x1e1b   : > { %3286 = vmatmul.mubr.msk.bf16.vlgmr.msra.gmra.mrb[64].mxu0 %vm1569_vm15, %v2650_v32 }
0x1eee   : > { %v2712_v31 = vpop.f32.mrb[64].mxu0 }
0x1eef   : > { %v2719_v34 = vadd.f32 %v2712_v31, %v4026_v43  ;;  %v3287_v36 = vpop.f32.mrb[65].mxu0 }
0x1ef0   : > { %v2715_v37 = vpop.f32.mrb[66].mxu0 }
0x1ef1   : > { %v2720_v38 = vadd.f32 %v2715_v37, %v4029_v40  ;;  %v3288_v15 = vpop.f32.mrb[67].mxu0  ;;  %v2722_v17 = vmul.f32 %v2719_v34, %v2719_v34 }
0x1ef3   : > { %v2724_v61 = vsel %vm488_vm0, %v2722_v17, 0.0  ;;  %v2723_v2 = vmul.f32 %v2720_v38, %v2720_v38 }
0x1ef4   : > { %2725 = vadd.xlane.f32.xlu1 %v2724_v61 }
0x1ef5   : > { %v2727_v60 = vsel %vm492_vm1, %v2723_v2, 0.0 }
0x1ef6   : > { %2728 = vadd.xlane.f32.xlu0 %v2727_v60 }
0x1f81   : > { %v2726_v35 = vpop.xlane.xlu1 %2725 }
0x1f82   : > { %v2730_v41 = vmul.f32 0.03125, %v2726_v35 }
0x1f83   : > { %v2729_v52 = vpop.xlane.xlu0 %2728 }
0x1f84   : > { %v2732_v53 = vadd.f32 1e-06, %v2730_v41  ;;  %v2731_v43 = vmul.f32 0.03125, %v2729_v52 }
0x1f86   : > { %3438 = vrsqrt.f32 %v2732_v53  ;;  %v2733_v45 = vadd.f32 1e-06, %v2731_v43 }
0x1f88   : > { %3440 = vrsqrt.f32 %v2733_v45 }
0x1f90   : > { %v3439_v46 = vpop.eup %3438 }
0x1f91   : > { %v2736_v40 = vmul.f32 %v3439_v46, %v2719_v34 }
0x1f92   : > { %v3441_v48 = vpop.eup %3440 }
0x1f93   : > { %v2737_v49 = vmul.f32 %v3441_v48, %v2720_v38  ;;  %v2744_v51 = vmul.f32 %v2964_v7, %v2736_v40 }
0x1f95   : > { %v2745_v28 = vmul.f32 %v2964_v7, %v2737_v49 }
0x1f97   : > { %v2750_v42 = vpack.c.bf16 %v2745_v28, %v2744_v51 }
0x1f99   : > { %3294 = vmatmul.mubr.msk.bf16.vlgmr.msra.gmra.mrb[68].mxu1 %vm488_vm0, %v2750_v42 }
0x206c   : > { %v2800_v44 = vpop.f32.mrb[68].mxu1 }
0x206d   : > { %2807 = vst [vmem:[%s454_s16] sm:$0xff] %v2800_v44  ;;  %v3295_v54 = vpop.f32.mrb[69].mxu1 }
0x206e   : > { %v2803_v47 = vpop.f32.mrb[70].mxu1 }
0x206f   : > { %2808 = vst [vmem:[%s454_s16 + $0x8] sm:$0x7f] %v2803_v47  ;;  %v3296_v50 = vpop.f32.mrb[71].mxu1 }
0x2070 PF: > { %s23_s25 = sadd.s32 1, %s3449_s25  }
0x2071   : > { %p20_p4 = scmp.ge.s32.totalorder %s23_s25, 4  }
0x2073   :  { %22 = sbr.rel (!%p20_p4) target bundleno = 1 (0x1), region = 111 }

</bundles_post_ra>
